<compile_context>
chip_gen: v7x
topology: tpu7x:2x2x1
jax: 0.10.0
libtpu: 0.0.40
codegen_flags: <defaults>
</compile_context>

<pallas_src>
import functools

import jax
import jax.numpy as jnp
from jax.experimental import pallas as pl
from jax.experimental.pallas import tpu as pltpu


def _inverted_res_block_kernel(
    xp_ref, xres_ref,
    w_exp_ref, s_exp_ref, b_exp_ref,
    w_dw_ref, s_dw_ref, b_dw_ref,
    g_pool_ref, w_se1_ref, b_se1_ref, w_se2_ref, b_se2_ref,
    w_pw_ref, s_pw_ref, b_pw_ref,
    o_ref,
    hpad_ref,
    *, H, W, Chid, k, pad, use_residual):
  """One grid step == one batch element; everything stays resident in VMEM."""

  def sigmoid(v):
    # exact form; jnp.exp rides the EUP slot (overflow for very negative v -> correct 0)
    return 1.0 / (1.0 + jnp.exp(-v))

  def silu(v):
    return v * sigmoid(v)

  Ho = H + 2 * pad - k + 1
  Wo = W + 2 * pad - k + 1
  Hp = H + 2 * pad
  WpC = (W + 2 * pad) * Chid

  # ---- expand 3x3 conv (stride 1, pad 1) + folded BN + SiLU: ONE structured GEMM ----
  # lhs row y = [xpad[y,:,:], xpad[y+1,:,:], xpad[y+2,:,:]] flattened (lane-dense NHWC rows)
  # TODO(synk): for large channel counts cast GEMM operands to bf16 on v6e/v7x.
  xp = xp_ref[0]                                            # (H+2, (W+2)*Cin)
  lhs = jnp.concatenate([xp[dh:dh + H, :] for dh in range(3)], axis=1)
  h = jnp.dot(lhs, w_exp_ref[...], preferred_element_type=jnp.float32)   # (H, W*Chid)
  h = silu(h * s_exp_ref[...] + b_exp_ref[...])

  # ---- stage into the zero-halo scratch used by the depthwise conv ----
  if pad > 0:   # zero only the halo border; interior is fully overwritten every step
    hpad_ref[0:pad, :] = jnp.zeros((pad, WpC), jnp.float32)
    hpad_ref[pad + H:Hp, :] = jnp.zeros((pad, WpC), jnp.float32)
    hpad_ref[pad:pad + H, 0:pad * Chid] = jnp.zeros((H, pad * Chid), jnp.float32)
    hpad_ref[pad:pad + H, (pad + W) * Chid:WpC] = jnp.zeros((H, pad * Chid), jnp.float32)
  hpad_ref[pad:pad + H, pad * Chid:(pad + W) * Chid] = h

  # ---- depthwise k x k conv (stride 1) + folded BN + SiLU, channels interleaved on lanes ----
  # TODO(synk): stride > 1 depthwise path not implemented (residual requires stride 1 anyway)
  acc = jnp.zeros((Ho, Wo * Chid), jnp.float32)
  for dh in range(k):
    for dw in range(k):
      t = dh * k + dw
      acc = acc + (hpad_ref[dh:dh + Ho, dw * Chid:(dw + Wo) * Chid]
                   * w_dw_ref[t:t + 1, :])
  h2 = silu(acc * s_dw_ref[...] + b_dw_ref[...])            # (Ho, Wo*Chid)

  # ---- squeeze-and-excitation (tiny; gate is pre-tiled along lanes) ----
  per_row = jnp.dot(h2, g_pool_ref[...], preferred_element_type=jnp.float32)  # (Ho, Chid)
  pooled = jnp.sum(per_row, axis=0, keepdims=True) * (1.0 / (Ho * Wo))        # (1, Chid)
  z1 = silu(jnp.sum(w_se1_ref[...] * pooled, axis=1, keepdims=True)
            + b_se1_ref[...])                                                 # (R, 1)
  gate = sigmoid(jnp.sum(z1 * w_se2_ref[...], axis=0, keepdims=True)
                 + b_se2_ref[...])                                            # (1, Wo*Chid)
  h3 = h2 * gate

  # ---- pointwise 1x1 conv (no bias) + folded BN (+ residual), layout-preserving GEMM ----
  out = jnp.dot(h3, w_pw_ref[...], preferred_element_type=jnp.float32)   # (Ho, Wo*Cout)
  out = out * s_pw_ref[...] + b_pw_ref[...]
  if use_residual:
    # TODO(synk): training-mode stochastic depth not implemented (eval mode => identity)
    out = out + xres_ref[0]
  o_ref[0] = out


def init_params(key, Cin, Cout, expand_ratio, reduction, k):
  """Deterministic synthetic parameters with PyTorch-convention shapes."""
  Chid = Cin * expand_ratio
  R = int(Cin / reduction)
  ks = jax.random.split(key, 21)

  def n(i, shape, scale=0.2):
    return scale * jax.random.normal(ks[i], shape, dtype=jnp.float32)

  return dict(
      w_exp=n(0, (Chid, Cin, 3, 3)),
      b_exp=n(1, (Chid,)),
      g_exp=1.0 + n(2, (Chid,)),
      be_exp=n(3, (Chid,)),
      rm_exp=n(4, (Chid,)),
      rv_exp=1.0 + 0.1 * jnp.abs(jax.random.normal(ks[5], (Chid,), jnp.float32)),
      w_dw=n(6, (Chid, 1, k, k)),
      b_dw=n(7, (Chid,)),
      g_dw=1.0 + n(8, (Chid,)),
      be_dw=n(9, (Chid,)),
      rm_dw=n(10, (Chid,)),
      rv_dw=1.0 + 0.1 * jnp.abs(jax.random.normal(ks[11], (Chid,), jnp.float32)),
      w_se1=n(12, (R, Chid, 1, 1)),
      b_se1=n(13, (R,)),
      w_se2=n(14, (Chid, R, 1, 1)),
      b_se2=n(15, (Chid,)),
      w_pw=n(16, (Cout, Chid, 1, 1)),
      g_pw=1.0 + n(17, (Cout,)),
      be_pw=n(18, (Cout,)),
      rm_pw=n(19, (Cout,)),
      rv_pw=1.0 + 0.1 * jnp.abs(jax.random.normal(ks[20], (Cout,), jnp.float32)),
  )


def inverted_res_block_forward(x_nchw, p, *, kernel_size, stride, padding,
                               expand_ratio, reduction, eps=1e-5):
  B, Cin, H, W = x_nchw.shape
  Chid = Cin * expand_ratio
  R = int(Cin / reduction)
  Cout = p['w_pw'].shape[0]
  use_residual = (Cin == Cout) and (stride == 1)
  assert stride == 1          # TODO(synk): stride > 1 not implemented in the kernel
  assert Chid != Cin          # TODO(synk): expand=False path not implemented
  k, pad = kernel_size, padding
  Ho = H + 2 * pad - k + 1
  Wo = W + 2 * pad - k + 1
  if use_residual:
    assert Ho == H and Wo == W, "residual path requires 'same' depthwise padding"

  f32 = jnp.float32
  Wp_e = W + 2                                              # expand conv is 3x3 / pad 1
  x_nhwc = jnp.transpose(x_nchw, (0, 2, 3, 1)).astype(f32)
  xp_ld = jnp.pad(x_nhwc, ((0, 0), (1, 1), (1, 1), (0, 0))).reshape(B, H + 2, Wp_e * Cin)
  x_ld = x_nhwc.reshape(B, H, W * Cin)                      # residual, lane-dense NHWC rows

  def fold(g, b, rm, rv, conv_b=None):
    s = g / jnp.sqrt(rv + eps)
    bias = (b - rm * s) if conv_b is None else ((conv_b - rm) * s + b)
    return s, bias

  s_exp, b_exp = fold(p['g_exp'], p['be_exp'], p['rm_exp'], p['rv_exp'], p['b_exp'])
  s_dw, b_dw = fold(p['g_dw'], p['be_dw'], p['rm_dw'], p['rv_dw'], p['b_dw'])
  s_pw, b_pw = fold(p['g_pw'], p['be_pw'], p['rm_pw'], p['rv_pw'])

  def tile_lanes(v, reps):    # (C,) -> (1, reps*C), channel-interleaved per-position vector
    return jnp.tile(v.reshape(1, -1), (1, reps)).astype(f32)

  # expand conv: one structured GEMM weight (3*(W+2)*Cin, W*Chid)
  w_exp = p['w_exp'].astype(f32)                            # (Chid, Cin, 3, 3)
  blocks = []
  for dh in range(3):
    blk = jnp.zeros((Wp_e * Cin, W * Chid), f32)
    for dw in range(3):
      band = jnp.eye(Wp_e, W, k=-dw, dtype=f32)             # 1 at (x+dw, x)
      blk = blk + jnp.kron(band, w_exp[:, :, dh, dw].T)     # (Cin, Chid) blocks
    blocks.append(blk)
  w_exp_struct = jnp.concatenate(blocks, axis=0)            # (3*(W+2)*Cin, W*Chid)
  s_exp_t = tile_lanes(s_exp, W)
  b_exp_t = tile_lanes(b_exp, W)

  # depthwise: per-tap weight rows tiled along lanes
  w_dw = jnp.transpose(p['w_dw'][:, 0], (1, 2, 0)).reshape(k * k, Chid)
  w_dw_t = jnp.tile(w_dw, (1, Wo)).astype(f32)              # (k*k, Wo*Chid)
  s_dw_t = tile_lanes(s_dw, Wo)
  b_dw_t = tile_lanes(b_dw, Wo)

  # squeeze-and-excitation
  g_pool = jnp.tile(jnp.eye(Chid, dtype=f32), (Wo, 1))      # (Wo*Chid, Chid) pooling matrix
  w_se1 = p['w_se1'][:, :, 0, 0].astype(f32)                # (R, Chid)
  b_se1 = p['b_se1'].reshape(R, 1).astype(f32)
  w_se2_t = jnp.tile(p['w_se2'][:, :, 0, 0].T, (1, Wo)).astype(f32)   # (R, Wo*Chid)
  b_se2_t = tile_lanes(p['b_se2'], Wo)

  # pointwise 1x1: block-diagonal weight keeps the lane-interleaved layout
  w_pw = p['w_pw'][:, :, 0, 0].astype(f32)                  # (Cout, Chid)
  w_pw_struct = jnp.kron(jnp.eye(Wo, dtype=f32), w_pw.T)    # (Wo*Chid, Wo*Cout)
  s_pw_t = tile_lanes(s_pw, Wo)
  b_pw_t = tile_lanes(b_pw, Wo)

  kernel = functools.partial(
      _inverted_res_block_kernel,
      H=H, W=W, Chid=Chid, k=k, pad=pad, use_residual=use_residual)

  def full(shape):
    n = len(shape)
    return pl.BlockSpec(shape, lambda b, n=n: (0,) * n)

  # TODO(synk): for real EfficientNet spatial sizes add a row-tile grid axis (+halo) and
  # set vmem_limit_bytes explicitly; a whole-image scratch would not scale on v7x VMEM.
  out_ld = pl.pallas_call(
      kernel,
      out_shape=jax.ShapeDtypeStruct((B, Ho, Wo * Cout), f32),
      grid_spec=pltpu.PrefetchScalarGridSpec(
          num_scalar_prefetch=0,
          grid=(B,),
          in_specs=[
              pl.BlockSpec((1, H + 2, Wp_e * Cin), lambda b: (b, 0, 0)),
              pl.BlockSpec((1, H, W * Cin), lambda b: (b, 0, 0)),
              full(w_exp_struct.shape), full(s_exp_t.shape), full(b_exp_t.shape),
              full(w_dw_t.shape), full(s_dw_t.shape), full(b_dw_t.shape),
              full(g_pool.shape), full(w_se1.shape), full(b_se1.shape),
              full(w_se2_t.shape), full(b_se2_t.shape),
              full(w_pw_struct.shape), full(s_pw_t.shape), full(b_pw_t.shape),
          ],
          out_specs=pl.BlockSpec((1, Ho, Wo * Cout), lambda b: (b, 0, 0)),
          scratch_shapes=[
              pltpu.VMEM((H + 2 * pad, (W + 2 * pad) * Chid), f32),   # depthwise halo buffer
          ],
      ),
      compiler_params=pltpu.CompilerParams(dimension_semantics=("parallel",)),
  )(xp_ld, x_ld, w_exp_struct, s_exp_t, b_exp_t,
    w_dw_t, s_dw_t, b_dw_t,
    g_pool, w_se1, b_se1, w_se2_t, b_se2_t,
    w_pw_struct, s_pw_t, b_pw_t)

  out_nhwc = out_ld.reshape(B, Ho, Wo, Cout)
  return jnp.transpose(out_nhwc, (0, 3, 1, 2))


def ref_forward(x, p, *, kernel_size, stride, padding, expand_ratio, reduction,
                eps=1e-5):
  """Plain-JAX reference (eval-mode PyTorch semantics) for verification."""
  Cin = x.shape[1]
  Chid = Cin * expand_ratio
  Cout = p['w_pw'].shape[0]
  use_residual = (Cin == Cout) and (stride == 1)

  def silu(v):
    return v * jax.nn.sigmoid(v)

  def bn(y, g, b, rm, rv):
    sh = (1, -1, 1, 1)
    return ((y - rm.reshape(sh)) / jnp.sqrt(rv.reshape(sh) + eps)
            * g.reshape(sh) + b.reshape(sh))

  dn = ('NCHW', 'OIHW', 'NCHW')
  y = jax.lax.conv_general_dilated(x, p['w_exp'], (1, 1), [(1, 1), (1, 1)],
                                   dimension_numbers=dn)
  y = y + p['b_exp'].reshape(1, -1, 1, 1)
  y = silu(bn(y, p['g_exp'], p['be_exp'], p['rm_exp'], p['rv_exp']))

  y = jax.lax.conv_general_dilated(y, p['w_dw'], (stride, stride),
                                   [(padding, padding), (padding, padding)],
                                   dimension_numbers=dn, feature_group_count=Chid)
  y = y + p['b_dw'].reshape(1, -1, 1, 1)
  y = silu(bn(y, p['g_dw'], p['be_dw'], p['rm_dw'], p['rv_dw']))

  pooled = jnp.mean(y, axis=(2, 3), keepdims=True)
  z = jnp.einsum('bchw,rc->brhw', pooled, p['w_se1'][:, :, 0, 0])
  z = silu(z + p['b_se1'].reshape(1, -1, 1, 1))
  z = jnp.einsum('brhw,cr->bchw', z, p['w_se2'][:, :, 0, 0])
  z = jax.nn.sigmoid(z + p['b_se2'].reshape(1, -1, 1, 1))
  y = y * z

  y = jnp.einsum('bchw,oc->bohw', y, p['w_pw'][:, :, 0, 0])
  y = bn(y, p['g_pw'], p['be_pw'], p['rm_pw'], p['rv_pw'])
  if use_residual:
    y = y + x
  return y


if __name__ == "__main__":
  # Block config: in=out=4 channels, k=3, stride=1, pad=1, expand_ratio=2 -> residual path.
  B, Cin, H, W = 2, 4, 16, 16
  Cout = 4
  expand_ratio, reduction = 2, 4
  kernel_size, stride, padding = 3, 1, 1

  key = jax.random.PRNGKey(0)
  kx, kp = jax.random.split(key)
  x = jax.random.normal(kx, (B, Cin, H, W), dtype=jnp.float32)
  params = init_params(kp, Cin, Cout, expand_ratio, reduction, kernel_size)

  out = inverted_res_block_forward(
      x, params, kernel_size=kernel_size, stride=stride, padding=padding,
      expand_ratio=expand_ratio, reduction=reduction)
  out = jax.block_until_ready(out)

  ref = ref_forward(x, params, kernel_size=kernel_size, stride=stride,
                    padding=padding, expand_ratio=expand_ratio,
                    reduction=reduction)
  assert out.shape == ref.shape, (out.shape, ref.shape)
  err = float(jnp.max(jnp.abs(out - ref)))
  assert jnp.allclose(out, ref, atol=1e-3, rtol=1e-3), f"max abs err {err}"
  print("KERNEL_OK")
</pallas_src>

<mosaic_0001>
module attributes {stable_mosaic.version = 11 : i64} {
  func.func @_inverted_res_block_kernel(%arg0: i32, %arg1: memref<1x18x72xf32, #tpu.memory_space<vmem>>, %arg2: memref<1x16x64xf32, #tpu.memory_space<vmem>>, %arg3: memref<216x128xf32, #tpu.memory_space<vmem>>, %arg4: memref<1x128xf32, #tpu.memory_space<vmem>>, %arg5: memref<1x128xf32, #tpu.memory_space<vmem>>, %arg6: memref<9x128xf32, #tpu.memory_space<vmem>>, %arg7: memref<1x128xf32, #tpu.memory_space<vmem>>, %arg8: memref<1x128xf32, #tpu.memory_space<vmem>>, %arg9: memref<128x8xf32, #tpu.memory_space<vmem>>, %arg10: memref<1x8xf32, #tpu.memory_space<vmem>>, %arg11: memref<1x1xf32, #tpu.memory_space<vmem>>, %arg12: memref<1x128xf32, #tpu.memory_space<vmem>>, %arg13: memref<1x128xf32, #tpu.memory_space<vmem>>, %arg14: memref<128x64xf32, #tpu.memory_space<vmem>>, %arg15: memref<1x64xf32, #tpu.memory_space<vmem>>, %arg16: memref<1x64xf32, #tpu.memory_space<vmem>>, %arg17: memref<1x16x64xf32, #tpu.memory_space<vmem>>, %arg18: memref<18x144xf32, #tpu.memory_space<vmem>>) attributes {dimension_semantics = [#tpu.dimension_semantics<parallel>], iteration_bounds = array<i64: 2>, scalar_prefetch = 0 : i64, scratch_operands = 1 : i64, tpu.core_type = #tpu.core_type<tc>, window_params = [{transform_indices = @transform_0, window_bounds = array<i64: 1, 18, 72>}, {transform_indices = @transform_1, window_bounds = array<i64: 1, 16, 64>}, {pipeline_mode = #tpu.pipeline_mode<synchronous>, transform_indices = @transform_2, window_bounds = array<i64: 216, 128>}, {pipeline_mode = #tpu.pipeline_mode<synchronous>, transform_indices = @transform_3, window_bounds = array<i64: 1, 128>}, {pipeline_mode = #tpu.pipeline_mode<synchronous>, transform_indices = @transform_4, window_bounds = array<i64: 1, 128>}, {pipeline_mode = #tpu.pipeline_mode<synchronous>, transform_indices = @transform_5, window_bounds = array<i64: 9, 128>}, {pipeline_mode = #tpu.pipeline_mode<synchronous>, transform_indices = @transform_6, window_bounds = array<i64: 1, 128>}, {pipeline_mode = #tpu.pipeline_mode<synchronous>, transform_indices = @transform_7, window_bounds = array<i64: 1, 128>}, {pipeline_mode = #tpu.pipeline_mode<synchronous>, transform_indices = @transform_8, window_bounds = array<i64: 128, 8>}, {pipeline_mode = #tpu.pipeline_mode<synchronous>, transform_indices = @transform_9, window_bounds = array<i64: 1, 8>}, {pipeline_mode = #tpu.pipeline_mode<synchronous>, transform_indices = @transform_10, window_bounds = array<i64: 1, 1>}, {pipeline_mode = #tpu.pipeline_mode<synchronous>, transform_indices = @transform_11, window_bounds = array<i64: 1, 128>}, {pipeline_mode = #tpu.pipeline_mode<synchronous>, transform_indices = @transform_12, window_bounds = array<i64: 1, 128>}, {pipeline_mode = #tpu.pipeline_mode<synchronous>, transform_indices = @transform_13, window_bounds = array<i64: 128, 64>}, {pipeline_mode = #tpu.pipeline_mode<synchronous>, transform_indices = @transform_14, window_bounds = array<i64: 1, 64>}, {pipeline_mode = #tpu.pipeline_mode<synchronous>, transform_indices = @transform_15, window_bounds = array<i64: 1, 64>}, {transform_indices = @transform_16, window_bounds = array<i64: 1, 16, 64>}]} {
    %c0 = arith.constant 0 : index
    %c0_0 = arith.constant 0 : index
    %c0_1 = arith.constant 0 : index
    %0 = vector.load %arg1[%c0, %c0_0, %c0_1] : memref<1x18x72xf32, #tpu.memory_space<vmem>>, vector<1x18x72xf32>
    %1 = vector.shape_cast %0 : vector<1x18x72xf32> to vector<18x72xf32>
    %2 = vector.extract_strided_slice %1 {offsets = [0, 0], sizes = [16, 72], strides = [1, 1]} : vector<18x72xf32> to vector<16x72xf32>
    %3 = vector.extract_strided_slice %1 {offsets = [1, 0], sizes = [16, 72], strides = [1, 1]} : vector<18x72xf32> to vector<16x72xf32>
    %4 = vector.extract_strided_slice %1 {offsets = [2, 0], sizes = [16, 72], strides = [1, 1]} : vector<18x72xf32> to vector<16x72xf32>
    %5 = tpu.concatenate %2, %3, %4 in 1 : vector<16x72xf32>, vector<16x72xf32>, vector<16x72xf32> -> vector<16x216xf32>
    %c0_2 = arith.constant 0 : index
    %c0_3 = arith.constant 0 : index
    %6 = vector.load %arg3[%c0_2, %c0_3] : memref<216x128xf32, #tpu.memory_space<vmem>>, vector<216x128xf32>
    %cst = arith.constant dense<0.000000e+00> : vector<16x128xf32>
    %7 = tpu.matmul %5, %6, %cst {dimension_numbers = #tpu.dot_dimension_numbers<[1], [0], [0], [1], [0, 0, 1, 1], [], []>} : vector<16x216xf32>, vector<216x128xf32>, vector<16x128xf32> -> vector<16x128xf32>
    %c0_4 = arith.constant 0 : index
    %c0_5 = arith.constant 0 : index
    %8 = vector.load %arg4[%c0_4, %c0_5] : memref<1x128xf32, #tpu.memory_space<vmem>>, vector<1x128xf32>
    %9 = vector.broadcast %8 : vector<1x128xf32> to vector<16x128xf32>
    %10 = arith.mulf %7, %9 : vector<16x128xf32>
    %c0_6 = arith.constant 0 : index
    %c0_7 = arith.constant 0 : index
    %11 = vector.load %arg5[%c0_6, %c0_7] : memref<1x128xf32, #tpu.memory_space<vmem>>, vector<1x128xf32>
    %12 = vector.broadcast %11 : vector<1x128xf32> to vector<16x128xf32>
    %13 = arith.addf %10, %12 : vector<16x128xf32>
    %cst_8 = arith.constant 0.000000e+00 : f32
    %14 = vector.broadcast %cst_8 : f32 to vector<16x128xf32>
    %15 = arith.subf %14, %13 : vector<16x128xf32>
    %16 = math.exp %15 : vector<16x128xf32>
    %cst_9 = arith.constant 1.000000e+00 : f32
    %17 = vector.broadcast %cst_9 : f32 to vector<16x128xf32>
    %18 = arith.addf %17, %16 : vector<16x128xf32>
    %cst_10 = arith.constant 1.000000e+00 : f32
    %19 = vector.broadcast %cst_10 : f32 to vector<16x128xf32>
    %20 = arith.divf %19, %18 : vector<16x128xf32>
    %21 = arith.mulf %13, %20 : vector<16x128xf32>
    %cst_11 = arith.constant 0.000000e+00 : f32
    %22 = vector.broadcast %cst_11 : f32 to vector<1x144xf32>
    %c0_12 = arith.constant 0 : index
    %c0_13 = arith.constant 0 : index
    %23 = vector.load %arg18[%c0_12, %c0_13] : memref<18x144xf32, #tpu.memory_space<vmem>>, vector<1x144xf32>
    tpu.vector_store %arg18[%c0_12, %c0_13], %22 {strides = array<i32>} : memref<18x144xf32, #tpu.memory_space<vmem>>, vector<1x144xf32>,
    %cst_14 = arith.constant 0.000000e+00 : f32
    %24 = vector.broadcast %cst_14 : f32 to vector<1x144xf32>
    %c17 = arith.constant 17 : index
    %c0_15 = arith.constant 0 : index
    %25 = vector.load %arg18[%c17, %c0_15] : memref<18x144xf32, #tpu.memory_space<vmem>>, vector<1x144xf32>
    tpu.vector_store %arg18[%c17, %c0_15], %24 {strides = array<i32>} : memref<18x144xf32, #tpu.memory_space<vmem>>, vector<1x144xf32>,
    %cst_16 = arith.constant 0.000000e+00 : f32
    %26 = vector.broadcast %cst_16 : f32 to vector<16x8xf32>
    %c1 = arith.constant 1 : index
    %c0_17 = arith.constant 0 : index
    %27 = vector.load %arg18[%c1, %c0_17] : memref<18x144xf32, #tpu.memory_space<vmem>>, vector<16x8xf32>
    tpu.vector_store %arg18[%c1, %c0_17], %26 {strides = array<i32>} : memref<18x144xf32, #tpu.memory_space<vmem>>, vector<16x8xf32>,
    %cst_18 = arith.constant 0.000000e+00 : f32
    %28 = vector.broadcast %cst_18 : f32 to vector<16x8xf32>
    %c1_19 = arith.constant 1 : index
    %c136 = arith.constant 136 : index
    %29 = vector.load %arg18[%c1_19, %c136] : memref<18x144xf32, #tpu.memory_space<vmem>>, vector<16x8xf32>
    tpu.vector_store %arg18[%c1_19, %c136], %28 {strides = array<i32>} : memref<18x144xf32, #tpu.memory_space<vmem>>, vector<16x8xf32>,
    %c1_20 = arith.constant 1 : index
    %c8 = arith.constant 8 : index
    %30 = vector.load %arg18[%c1_20, %c8] : memref<18x144xf32, #tpu.memory_space<vmem>>, vector<16x128xf32>
    tpu.vector_store %arg18[%c1_20, %c8], %21 {strides = array<i32>} : memref<18x144xf32, #tpu.memory_space<vmem>>, vector<16x128xf32>,
    %cst_21 = arith.constant 0.000000e+00 : f32
    %31 = vector.broadcast %cst_21 : f32 to vector<16x128xf32>
    %c0_22 = arith.constant 0 : index
    %c0_23 = arith.constant 0 : index
    %32 = vector.load %arg18[%c0_22, %c0_23] : memref<18x144xf32, #tpu.memory_space<vmem>>, vector<16x128xf32>
    %c0_24 = arith.constant 0 : index
    %c0_25 = arith.constant 0 : index
    %33 = vector.load %arg6[%c0_24, %c0_25] : memref<9x128xf32, #tpu.memory_space<vmem>>, vector<1x128xf32>
    %34 = vector.broadcast %33 : vector<1x128xf32> to vector<16x128xf32>
    %35 = arith.mulf %32, %34 : vector<16x128xf32>
    %36 = arith.addf %31, %35 : vector<16x128xf32>
    %c0_26 = arith.constant 0 : index
    %c8_27 = arith.constant 8 : index
    %37 = vector.load %arg18[%c0_26, %c8_27] : memref<18x144xf32, #tpu.memory_space<vmem>>, vector<16x128xf32>
    %c1_28 = arith.constant 1 : index
    %c0_29 = arith.constant 0 : index
    %38 = vector.load %arg6[%c1_28, %c0_29] : memref<9x128xf32, #tpu.memory_space<vmem>>, vector<1x128xf32>
    %39 = vector.broadcast %38 : vector<1x128xf32> to vector<16x128xf32>
    %40 = arith.mulf %37, %39 : vector<16x128xf32>
    %41 = arith.addf %36, %40 : vector<16x128xf32>
    %c0_30 = arith.constant 0 : index
    %c16 = arith.constant 16 : index
    %42 = vector.load %arg18[%c0_30, %c16] : memref<18x144xf32, #tpu.memory_space<vmem>>, vector<16x128xf32>
    %c2 = arith.constant 2 : index
    %c0_31 = arith.constant 0 : index
    %43 = vector.load %arg6[%c2, %c0_31] : memref<9x128xf32, #tpu.memory_space<vmem>>, vector<1x128xf32>
    %44 = vector.broadcast %43 : vector<1x128xf32> to vector<16x128xf32>
    %45 = arith.mulf %42, %44 : vector<16x128xf32>
    %46 = arith.addf %41, %45 : vector<16x128xf32>
    %c1_32 = arith.constant 1 : index
    %c0_33 = arith.constant 0 : index
    %47 = vector.load %arg18[%c1_32, %c0_33] : memref<18x144xf32, #tpu.memory_space<vmem>>, vector<16x128xf32>
    %c3 = arith.constant 3 : index
    %c0_34 = arith.constant 0 : index
    %48 = vector.load %arg6[%c3, %c0_34] : memref<9x128xf32, #tpu.memory_space<vmem>>, vector<1x128xf32>
    %49 = vector.broadcast %48 : vector<1x128xf32> to vector<16x128xf32>
    %50 = arith.mulf %47, %49 : vector<16x128xf32>
    %51 = arith.addf %46, %50 : vector<16x128xf32>
    %c1_35 = arith.constant 1 : index
    %c8_36 = arith.constant 8 : index
    %52 = vector.load %arg18[%c1_35, %c8_36] : memref<18x144xf32, #tpu.memory_space<vmem>>, vector<16x128xf32>
    %c4 = arith.constant 4 : index
    %c0_37 = arith.constant 0 : index
    %53 = vector.load %arg6[%c4, %c0_37] : memref<9x128xf32, #tpu.memory_space<vmem>>, vector<1x128xf32>
    %54 = vector.broadcast %53 : vector<1x128xf32> to vector<16x128xf32>
    %55 = arith.mulf %52, %54 : vector<16x128xf32>
    %56 = arith.addf %51, %55 : vector<16x128xf32>
    %c1_38 = arith.constant 1 : index
    %c16_39 = arith.constant 16 : index
    %57 = vector.load %arg18[%c1_38, %c16_39] : memref<18x144xf32, #tpu.memory_space<vmem>>, vector<16x128xf32>
    %c5 = arith.constant 5 : index
    %c0_40 = arith.constant 0 : index
    %58 = vector.load %arg6[%c5, %c0_40] : memref<9x128xf32, #tpu.memory_space<vmem>>, vector<1x128xf32>
    %59 = vector.broadcast %58 : vector<1x128xf32> to vector<16x128xf32>
    %60 = arith.mulf %57, %59 : vector<16x128xf32>
    %61 = arith.addf %56, %60 : vector<16x128xf32>
    %c2_41 = arith.constant 2 : index
    %c0_42 = arith.constant 0 : index
    %62 = vector.load %arg18[%c2_41, %c0_42] : memref<18x144xf32, #tpu.memory_space<vmem>>, vector<16x128xf32>
    %c6 = arith.constant 6 : index
    %c0_43 = arith.constant 0 : index
    %63 = vector.load %arg6[%c6, %c0_43] : memref<9x128xf32, #tpu.memory_space<vmem>>, vector<1x128xf32>
    %64 = vector.broadcast %63 : vector<1x128xf32> to vector<16x128xf32>
    %65 = arith.mulf %62, %64 : vector<16x128xf32>
    %66 = arith.addf %61, %65 : vector<16x128xf32>
    %c2_44 = arith.constant 2 : index
    %c8_45 = arith.constant 8 : index
    %67 = vector.load %arg18[%c2_44, %c8_45] : memref<18x144xf32, #tpu.memory_space<vmem>>, vector<16x128xf32>
    %c7 = arith.constant 7 : index
    %c0_46 = arith.constant 0 : index
    %68 = vector.load %arg6[%c7, %c0_46] : memref<9x128xf32, #tpu.memory_space<vmem>>, vector<1x128xf32>
    %69 = vector.broadcast %68 : vector<1x128xf32> to vector<16x128xf32>
    %70 = arith.mulf %67, %69 : vector<16x128xf32>
    %71 = arith.addf %66, %70 : vector<16x128xf32>
    %c2_47 = arith.constant 2 : index
    %c16_48 = arith.constant 16 : index
    %72 = vector.load %arg18[%c2_47, %c16_48] : memref<18x144xf32, #tpu.memory_space<vmem>>, vector<16x128xf32>
    %c8_49 = arith.constant 8 : index
    %c0_50 = arith.constant 0 : index
    %73 = vector.load %arg6[%c8_49, %c0_50] : memref<9x128xf32, #tpu.memory_space<vmem>>, vector<1x128xf32>
    %74 = vector.broadcast %73 : vector<1x128xf32> to vector<16x128xf32>
    %75 = arith.mulf %72, %74 : vector<16x128xf32>
    %76 = arith.addf %71, %75 : vector<16x128xf32>
    %c0_51 = arith.constant 0 : index
    %c0_52 = arith.constant 0 : index
    %77 = vector.load %arg7[%c0_51, %c0_52] : memref<1x128xf32, #tpu.memory_space<vmem>>, vector<1x128xf32>
    %78 = vector.broadcast %77 : vector<1x128xf32> to vector<16x128xf32>
    %79 = arith.mulf %76, %78 : vector<16x128xf32>
    %c0_53 = arith.constant 0 : index
    %c0_54 = arith.constant 0 : index
    %80 = vector.load %arg8[%c0_53, %c0_54] : memref<1x128xf32, #tpu.memory_space<vmem>>, vector<1x128xf32>
    %81 = vector.broadcast %80 : vector<1x128xf32> to vector<16x128xf32>
    %82 = arith.addf %79, %81 : vector<16x128xf32>
    %cst_55 = arith.constant 0.000000e+00 : f32
    %83 = vector.broadcast %cst_55 : f32 to vector<16x128xf32>
    %84 = arith.subf %83, %82 : vector<16x128xf32>
    %85 = math.exp %84 : vector<16x128xf32>
    %cst_56 = arith.constant 1.000000e+00 : f32
    %86 = vector.broadcast %cst_56 : f32 to vector<16x128xf32>
    %87 = arith.addf %86, %85 : vector<16x128xf32>
    %cst_57 = arith.constant 1.000000e+00 : f32
    %88 = vector.broadcast %cst_57 : f32 to vector<16x128xf32>
    %89 = arith.divf %88, %87 : vector<16x128xf32>
    %90 = arith.mulf %82, %89 : vector<16x128xf32>
    %c0_58 = arith.constant 0 : index
    %c0_59 = arith.constant 0 : index
    %91 = vector.load %arg9[%c0_58, %c0_59] : memref<128x8xf32, #tpu.memory_space<vmem>>, vector<128x8xf32>
    %cst_60 = arith.constant dense<0.000000e+00> : vector<16x8xf32>
    %92 = tpu.matmul %90, %91, %cst_60 {dimension_numbers = #tpu.dot_dimension_numbers<[1], [0], [0], [1], [0, 0, 1, 1], [], []>} : vector<16x128xf32>, vector<128x8xf32>, vector<16x8xf32> -> vector<16x8xf32>
    %cst_61 = arith.constant dense<0.000000e+00> : vector<8xf32>
    %93 = vector.multi_reduction <add>, %92, %cst_61 [0] : vector<16x8xf32> to vector<8xf32>
    %94 = vector.shape_cast %93 : vector<8xf32> to vector<1x8xf32>
    %cst_62 = arith.constant 3.906250e-03 : f32
    %95 = vector.broadcast %cst_62 : f32 to vector<1x8xf32>
    %96 = arith.mulf %94, %95 : vector<1x8xf32>
    %c0_63 = arith.constant 0 : index
    %c0_64 = arith.constant 0 : index
    %97 = vector.load %arg10[%c0_63, %c0_64] : memref<1x8xf32, #tpu.memory_space<vmem>>, vector<1x8xf32>
    %98 = arith.mulf %97, %96 : vector<1x8xf32>
    %cst_65 = arith.constant dense<0.000000e+00> : vector<1xf32>
    %99 = vector.multi_reduction <add>, %98, %cst_65 [1] : vector<1x8xf32> to vector<1xf32>
    %100 = vector.shape_cast %99 : vector<1xf32> to vector<1x1xf32>
    %c0_66 = arith.constant 0 : index
    %c0_67 = arith.constant 0 : index
    %101 = vector.load %arg11[%c0_66, %c0_67] : memref<1x1xf32, #tpu.memory_space<vmem>>, vector<1x1xf32>
    %102 = arith.addf %100, %101 : vector<1x1xf32>
    %cst_68 = arith.constant 0.000000e+00 : f32
    %103 = vector.broadcast %cst_68 : f32 to vector<1x1xf32>
    %104 = arith.subf %103, %102 : vector<1x1xf32>
    %105 = math.exp %104 : vector<1x1xf32>
    %cst_69 = arith.constant 1.000000e+00 : f32
    %106 = vector.broadcast %cst_69 : f32 to vector<1x1xf32>
    %107 = arith.addf %106, %105 : vector<1x1xf32>
    %cst_70 = arith.constant 1.000000e+00 : f32
    %108 = vector.broadcast %cst_70 : f32 to vector<1x1xf32>
    %109 = arith.divf %108, %107 : vector<1x1xf32>
    %110 = arith.mulf %102, %109 : vector<1x1xf32>
    %c0_71 = arith.constant 0 : index
    %c0_72 = arith.constant 0 : index
    %111 = vector.load %arg12[%c0_71, %c0_72] : memref<1x128xf32, #tpu.memory_space<vmem>>, vector<1x128xf32>
    %112 = vector.broadcast %110 : vector<1x1xf32> to vector<1x128xf32>
    %113 = arith.mulf %112, %111 : vector<1x128xf32>
    %cst_73 = arith.constant dense<0.000000e+00> : vector<128xf32>
    %114 = vector.multi_reduction <add>, %113, %cst_73 [0] : vector<1x128xf32> to vector<128xf32>
    %115 = vector.shape_cast %114 : vector<128xf32> to vector<1x128xf32>
    %c0_74 = arith.constant 0 : index
    %c0_75 = arith.constant 0 : index
    %116 = vector.load %arg13[%c0_74, %c0_75] : memref<1x128xf32, #tpu.memory_space<vmem>>, vector<1x128xf32>
    %117 = arith.addf %115, %116 : vector<1x128xf32>
    %cst_76 = arith.constant 0.000000e+00 : f32
    %118 = vector.broadcast %cst_76 : f32 to vector<1x128xf32>
    %119 = arith.subf %118, %117 : vector<1x128xf32>
    %120 = math.exp %119 : vector<1x128xf32>
    %cst_77 = arith.constant 1.000000e+00 : f32
    %121 = vector.broadcast %cst_77 : f32 to vector<1x128xf32>
    %122 = arith.addf %121, %120 : vector<1x128xf32>
    %cst_78 = arith.constant 1.000000e+00 : f32
    %123 = vector.broadcast %cst_78 : f32 to vector<1x128xf32>
    %124 = arith.divf %123, %122 : vector<1x128xf32>
    %125 = vector.broadcast %124 : vector<1x128xf32> to vector<16x128xf32>
    %126 = arith.mulf %90, %125 : vector<16x128xf32>
    %c0_79 = arith.constant 0 : index
    %c0_80 = arith.constant 0 : index
    %127 = vector.load %arg14[%c0_79, %c0_80] : memref<128x64xf32, #tpu.memory_space<vmem>>, vector<128x64xf32>
    %cst_81 = arith.constant dense<0.000000e+00> : vector<16x64xf32>
    %128 = tpu.matmul %126, %127, %cst_81 {dimension_numbers = #tpu.dot_dimension_numbers<[1], [0], [0], [1], [0, 0, 1, 1], [], []>} : vector<16x128xf32>, vector<128x64xf32>, vector<16x64xf32> -> vector<16x64xf32>
    %c0_82 = arith.constant 0 : index
    %c0_83 = arith.constant 0 : index
    %129 = vector.load %arg15[%c0_82, %c0_83] : memref<1x64xf32, #tpu.memory_space<vmem>>, vector<1x64xf32>
    %130 = vector.broadcast %129 : vector<1x64xf32> to vector<16x64xf32>
    %131 = arith.mulf %128, %130 : vector<16x64xf32>
    %c0_84 = arith.constant 0 : index
    %c0_85 = arith.constant 0 : index
    %132 = vector.load %arg16[%c0_84, %c0_85] : memref<1x64xf32, #tpu.memory_space<vmem>>, vector<1x64xf32>
    %133 = vector.broadcast %132 : vector<1x64xf32> to vector<16x64xf32>
    %134 = arith.addf %131, %133 : vector<16x64xf32>
    %c0_86 = arith.constant 0 : index
    %c0_87 = arith.constant 0 : index
    %c0_88 = arith.constant 0 : index
    %135 = vector.load %arg2[%c0_86, %c0_87, %c0_88] : memref<1x16x64xf32, #tpu.memory_space<vmem>>, vector<1x16x64xf32>
    %136 = vector.shape_cast %135 : vector<1x16x64xf32> to vector<16x64xf32>
    %137 = arith.addf %134, %136 : vector<16x64xf32>
    %c0_89 = arith.constant 0 : index
    %c0_90 = arith.constant 0 : index
    %c0_91 = arith.constant 0 : index
    %138 = vector.load %arg17[%c0_89, %c0_90, %c0_91] : memref<1x16x64xf32, #tpu.memory_space<vmem>>, vector<1x16x64xf32>
    %139 = vector.shape_cast %138 : vector<1x16x64xf32> to vector<16x64xf32>
    %140 = vector.shape_cast %137 : vector<16x64xf32> to vector<1x16x64xf32>
    tpu.vector_store %arg17[%c0_89, %c0_90, %c0_91], %140 {strides = array<i32>} : memref<1x16x64xf32, #tpu.memory_space<vmem>>, vector<1x16x64xf32>,
    return
  }
  func.func @transform_0(%arg0: i32) -> (i32, i32, i32) {
    %c0_i32 = arith.constant 0 : i32
    %c0_i32_0 = arith.constant 0 : i32
    %c0_i32_1 = arith.constant 0 : i32
    return %arg0, %c0_i32, %c0_i32_0 : i32, i32, i32
  }
  func.func @transform_1(%arg0: i32) -> (i32, i32, i32) {
    %c0_i32 = arith.constant 0 : i32
    %c0_i32_0 = arith.constant 0 : i32
    %c0_i32_1 = arith.constant 0 : i32
    return %arg0, %c0_i32, %c0_i32_0 : i32, i32, i32
  }
  func.func @transform_2(%arg0: i32) -> (i32, i32) {
    %c0_i32 = arith.constant 0 : i32
    %c0_i32_0 = arith.constant 0 : i32
    %c0_i32_1 = arith.constant 0 : i32
    return %c0_i32, %c0_i32_0 : i32, i32
  }
  func.func @transform_3(%arg0: i32) -> (i32, i32) {
    %c0_i32 = arith.constant 0 : i32
    %c0_i32_0 = arith.constant 0 : i32
    %c0_i32_1 = arith.constant 0 : i32
    return %c0_i32, %c0_i32_0 : i32, i32
  }
  func.func @transform_4(%arg0: i32) -> (i32, i32) {
    %c0_i32 = arith.constant 0 : i32
    %c0_i32_0 = arith.constant 0 : i32
    %c0_i32_1 = arith.constant 0 : i32
    return %c0_i32, %c0_i32_0 : i32, i32
  }
  func.func @transform_5(%arg0: i32) -> (i32, i32) {
    %c0_i32 = arith.constant 0 : i32
    %c0_i32_0 = arith.constant 0 : i32
    %c0_i32_1 = arith.constant 0 : i32
    return %c0_i32, %c0_i32_0 : i32, i32
  }
  func.func @transform_6(%arg0: i32) -> (i32, i32) {
    %c0_i32 = arith.constant 0 : i32
    %c0_i32_0 = arith.constant 0 : i32
    %c0_i32_1 = arith.constant 0 : i32
    return %c0_i32, %c0_i32_0 : i32, i32
  }
  func.func @transform_7(%arg0: i32) -> (i32, i32) {
    %c0_i32 = arith.constant 0 : i32
    %c0_i32_0 = arith.constant 0 : i32
    %c0_i32_1 = arith.constant 0 : i32
    return %c0_i32, %c0_i32_0 : i32, i32
  }
  func.func @transform_8(%arg0: i32) -> (i32, i32) {
    %c0_i32 = arith.constant 0 : i32
    %c0_i32_0 = arith.constant 0 : i32
    %c0_i32_1 = arith.constant 0 : i32
    return %c0_i32, %c0_i32_0 : i32, i32
  }
  func.func @transform_9(%arg0: i32) -> (i32, i32) {
    %c0_i32 = arith.constant 0 : i32
    %c0_i32_0 = arith.constant 0 : i32
    %c0_i32_1 = arith.constant 0 : i32
    return %c0_i32, %c0_i32_0 : i32, i32
  }
  func.func @transform_10(%arg0: i32) -> (i32, i32) {
    %c0_i32 = arith.constant 0 : i32
    %c0_i32_0 = arith.constant 0 : i32
    %c0_i32_1 = arith.constant 0 : i32
    return %c0_i32, %c0_i32_0 : i32, i32
  }
  func.func @transform_11(%arg0: i32) -> (i32, i32) {
    %c0_i32 = arith.constant 0 : i32
    %c0_i32_0 = arith.constant 0 : i32
    %c0_i32_1 = arith.constant 0 : i32
    return %c0_i32, %c0_i32_0 : i32, i32
  }
  func.func @transform_12(%arg0: i32) -> (i32, i32) {
    %c0_i32 = arith.constant 0 : i32
    %c0_i32_0 = arith.constant 0 : i32
    %c0_i32_1 = arith.constant 0 : i32
    return %c0_i32, %c0_i32_0 : i32, i32
  }
  func.func @transform_13(%arg0: i32) -> (i32, i32) {
    %c0_i32 = arith.constant 0 : i32
    %c0_i32_0 = arith.constant 0 : i32
    %c0_i32_1 = arith.constant 0 : i32
    return %c0_i32, %c0_i32_0 : i32, i32
  }
  func.func @transform_14(%arg0: i32) -> (i32, i32) {
    %c0_i32 = arith.constant 0 : i32
    %c0_i32_0 = arith.constant 0 : i32
    %c0_i32_1 = arith.constant 0 : i32
    return %c0_i32, %c0_i32_0 : i32, i32
  }
  func.func @transform_15(%arg0: i32) -> (i32, i32) {
    %c0_i32 = arith.constant 0 : i32
    %c0_i32_0 = arith.constant 0 : i32
    %c0_i32_1 = arith.constant 0 : i32
    return %c0_i32, %c0_i32_0 : i32, i32
  }
  func.func @transform_16(%arg0: i32) -> (i32, i32, i32) {
    %c0_i32 = arith.constant 0 : i32
    %c0_i32_0 = arith.constant 0 : i32
    %c0_i32_1 = arith.constant 0 : i32
    return %arg0, %c0_i32, %c0_i32_0 : i32, i32, i32
  }
}

</mosaic_0001>

<bundles_post_ra>
// kernel: tpu_custom_call.1
= control target key start
LH: loop header
LB: loop body
LE: loop exit
PB: predicated region body
PF: predicated region fallthrough
CT: control target
= control target key end

     0   :  { %s2420_s0 = inlined_call_operand.vmem [shape: f32[2,18,72], index: 0, kind: input, shape index: {}]   ;;  %s2421_s1 = inlined_call_operand.vmem [shape: f32[2,16,64], index: 1, kind: input, shape index: {}]   ;;  %s2422_s2 = inlined_call_operand.vmem [shape: f32[216,128], index: 2, kind: input, shape index: {}]   ;;  %s2423_s3 = inlined_call_operand.vmem [shape: f32[1,128], index: 3, kind: input, shape index: {}]   ;;  %s2424_s4 = inlined_call_operand.vmem [shape: f32[1,128], index: 4, kind: input, shape index: {}]   ;;  %s2425_s5 = inlined_call_operand.vmem [shape: f32[9,128], index: 5, kind: input, shape index: {}]   ;;  %s2426_s6 = inlined_call_operand.vmem [shape: f32[1,128], index: 6, kind: input, shape index: {}]   ;;  %s2427_s7 = inlined_call_operand.vmem [shape: f32[1,128], index: 7, kind: input, shape index: {}]   ;;  %s2428_s8 = inlined_call_operand.vmem [shape: f32[128,8], index: 8, kind: input, shape index: {}]   ;;  %s2429_s9 = inlined_call_operand.vmem [shape: f32[1,8], index: 9, kind: input, shape index: {}]   ;;  %s2430_s10 = inlined_call_operand.<no memory space> [shape: f32[1,1], index: 10, kind: input, shape index: {}]   ;;  %s2431_s11 = inlined_call_operand.vmem [shape: f32[1,128], index: 11, kind: input, shape index: {}]   ;;  %s2432_s12 = inlined_call_operand.vmem [shape: f32[1,128], index: 12, kind: input, shape index: {}]   ;;  %s2433_s13 = inlined_call_operand.vmem [shape: f32[128,64], index: 13, kind: input, shape index: {}]   ;;  %s2434_s14 = inlined_call_operand.vmem [shape: f32[1,64], index: 14, kind: input, shape index: {}]   ;;  %s2435_s15 = inlined_call_operand.vmem [shape: f32[1,64], index: 15, kind: input, shape index: {}]   ;;  %s2436_s16 = inlined_call_operand.hbm [shape: f32[2,16,64], index: 16, kind: output, shape index: {}]  }
   0x1   :  { %2441 = sst [smem:[#allocation10_spill]] %s2420_s0  ;;  %v21_v0 = vstv %s2430_s10 }
   0x2   :  { %2442 = sst [smem:[#allocation11_spill]] %s2422_s2  ;;  %22 = vst [vmem:[#allocation3] sm:$0x1] %v21_v0 }
   0x3   :  { %2443 = sst [smem:[#allocation12_spill]] %s2423_s3 }
   0x4   :  { %23 = vsyncpa [#allocation5], 0 }
   0x5   :  { %25 = vsyncpa [#allocation5 + $0x1], 0  ;;  %s1919_s23 = smov 0   ;;  %s1921_s24 = smov 0  }
   0x6   :  { %s1923_s25 = smov 0   ;;  %s1925_s26 = smov 0  }
   0x7 LB: > { %2444 = sst [smem:[#allocation7_spill]] %s1815_s25  ;;  %s1940_s10 = sadd.s32 4294967295, %s1819_s26   ;;  %s1819_s26 = sphi %s1925_s26, %s2453_s26   ;;  %s1815_s25 = sphi %s1923_s25, %s2455_s25   ;;  %s1811_s24 = sphi %s1921_s24, %s2457_s24   ;;  %s1807_s23 = sphi %s1919_s23, %s2456_s23  }
   0x8   : > { %s1442_s27 = sadd.s32 4294967294, %s1819_s26   ;;  %s1944_s28 = sadd.s32 1, %s1819_s26  }
   0x9   : > { %2445 = sst [smem:[#allocation8_spill]] %s1944_s28  ;;  %s384_s29 = sadd.s32 1, %s1815_s25 }
   0xa   : > { %s381_s30 = ssub.s32 %s1819_s26, %s1944_s28  ;;  %p394_p0 = scmp.ne.s32.totalorder %s1815_s25, %s1811_s24 }
   0xb   : > { %p382_p1 = scmp.eq.s32.totalorder %s381_s30, 0  ;;  %p395_p2 = scmp.eq.s32.totalorder %s1940_s10, 1 }
   0xc   : > { %p400_p3 = scmp.ne.s32.totalorder %s1811_s24, %s1807_s23  ;;  %p401_p4 = scmp.eq.s32.totalorder %s1442_s27, 1 }
   0xd   : > { %s1955_s0 = scalar_select %p382_p1, %s1815_s25, %s384_s29  }
   0xe   : > { %p1957_p5 = por %p395_p2, %p394_p0  ;;  %p1961_p6 = por %p401_p4, %p400_p3 }
   0xf   : > { %2446 = sst [smem:[#allocation9_spill]] %s1955_s0  ;;  %p1445_p7 = scmp.ge.s32.totalorder %s1819_s26, 1 }
  0x10   : > { %p477_p8 = scmp.lt.s32.totalorder %s1819_s26, 3 }
  0x12   : > { %p478_p9 = pnand %p1445_p7, %p477_p8 }
  0x13   : > { %p532_p10 = scmp.lt.s32.totalorder (!%p478_p9), %s1940_s10, 1  ;;  %s2449_s2 = sld [smem:[#allocation11_spill]] (!%p478_p9)  ;;  %v1821_v2 = vmov (!%p478_p9), 0.0|0.0   ;;  %vm548_vm0 = vcmask (!%p478_p9), 1046528   ;;  %vm560_vm1 = vcmask (!%p478_p9), 1045504   ;;  %v1824_v54 = vmov (!%p478_p9), 0.0  }
  0x14   : > { %481 = sbr.rel (%p478_p9) target bundleno = 1533 (0x5fd), region = 84  ;;  %1580 = vmatprep.subr.bf16.mxu0 (!%p478_p9), %v1821_v2  ;;  %s2450_s29 = sld [smem:[#allocation10_spill]] (!%p478_p9)  ;;  %vm575_vm2 = vcmask (!%p478_p9), 130048   ;;  %vm605_vm3 = vcmask (!%p478_p9), 719872   ;;  %vm572_vm4 = vcmask (!%p478_p9), 588800   ;;  %vm728_vm5 = vcmask (!%p478_p9), 64513  }
  0x15   : > { %s1822_s22 = smov (!%p478_p9), 72   ;;  %s1823_s28 = smov (!%p478_p9), 16   ;;  %vm734_vm6 = vcmask (!%p478_p9), 130113   ;;  %729 = vst.msk [vmem:[#allocation2] sm:$0xfe] (!%p478_p9), %vm728_vm5, %v1824_v54  ;;  %vm732_vm8 = vcmask (!%p478_p9), 57344  }
  0x16   : > { %735 = vst.msk [vmem:[#allocation2 + $0x8] sm:$0xfe] (!%p478_p9), %vm734_vm6, %v1824_v54  ;;  %s2451_s3 = sld [smem:[#allocation12_spill]] (!%p478_p9)  ;;  %vm738_vm9 = vcmask (!%p478_p9), 122944   ;;  %vm730_vm10 = vcmask (!%p478_p9), 64512   ;;  %vm736_vm11 = vcmask (!%p478_p9), 130112  }
  0x17   : > { %733 = vst.msk [vmem:[#allocation2 + $0x20] sm:$0x1] (!%p478_p9), %vm732_vm8, %v1824_v54  ;;  %vm742_vm12 = vcmask (!%p478_p9), 1040384   ;;  %vm755_vm13 = vcmask (!%p478_p9), 1047617   ;;  %vm761_vm14 = vcmask (!%p478_p9), 1040448   ;;  %vm758_vm15 = vcmask (!%p478_p9), 1047616  }
  0x18   : > { %739 = vst.msk [vmem:[#allocation2 + $0x28] sm:$0x1] (!%p478_p9), %vm738_vm9, %v1824_v54 }
  0x19   : > { %v578_v1 = vld [vmem:[%s2449_s2] sm:$0xff] (!%p478_p9)  ;;  %v579_v3 = vld [vmem:[%s2449_s2 + $0x8] sm:$0xff] (!%p478_p9)  ;;  %v580_v4 = vld [vmem:[%s2449_s2 + $0x10] sm:$0xff] (!%p478_p9)  ;;  %731 = vst.msk [vmem:[#allocation2 + $0x10] sm:$0xff] (!%p478_p9), %vm730_vm10, %v1824_v54 }
  0x1a   : > { %v581_v5 = vld [vmem:[%s2449_s2 + $0x18] sm:$0xff] (!%p478_p9)  ;;  %v1581_v6 = vpack.c.bf16 (!%p478_p9), %v579_v3, %v578_v1  ;;  %v582_v8 = vld [vmem:[%s2449_s2 + $0x20] sm:$0xff] (!%p478_p9)  ;;  %v583_v9 = vld [vmem:[%s2449_s2 + $0x28] sm:$0xff] (!%p478_p9)  ;;  %737 = vst.msk [vmem:[#allocation2 + $0x18] sm:$0xff] (!%p478_p9), %vm736_vm11, %v1824_v54 }
  0x1b   : > { %s1982_s25 = scalar_select %p532_p10, %s1940_s10, 1  ;;  %v1584_v7 = vpack.c.bf16 %v581_v5, %v580_v4  ;;  %v1587_v13 = vpack.c.bf16 %v583_v9, %v582_v8  ;;  %v584_v20 = vld [vmem:[%s2449_s2 + $0x30] sm:$0xff]  ;;  %v585_v21 = vld [vmem:[%s2449_s2 + $0x38] sm:$0xff]  ;;  %v586_v27 = vld [vmem:[%s2449_s2 + $0x40] sm:$0xff] }
  0x1c   : > { %1582 = vmatpush1.bf16.msra.mxu0 %v1581_v6  ;;  %v1590_v26 = vpack.c.bf16 %v585_v21, %v584_v20  ;;  %v587_v28 = vld [vmem:[%s2449_s2 + $0x48] sm:$0xff]  ;;  %v588_v30 = vld [vmem:[%s2449_s2 + $0x50] sm:$0xff]  ;;  %v589_v31 = vld [vmem:[%s2449_s2 + $0x58] sm:$0xff] }
  0x1d   : > { %s1683_s19 = smul.u32 24, %s1982_s25  ;;  %1583 = vmatprep.subr.bf16.mxu0 %v1821_v2  ;;  %v1593_v29 = vpack.c.bf16 %v587_v28, %v586_v27  ;;  %v1596_v32 = vpack.c.bf16 %v589_v31, %v588_v30  ;;  %v590_v33 = vld [vmem:[%s2449_s2 + $0x60] sm:$0xff]  ;;  %v591_v34 = vld [vmem:[%s2449_s2 + $0x68] sm:$0xff]  ;;  %v592_v36 = vld [vmem:[%s2449_s2 + $0x70] sm:$0xff] }
  0x1e   : > { %v1599_v35 = vpack.c.bf16 %v591_v34, %v590_v33  ;;  %v593_v37 = vld [vmem:[%s2449_s2 + $0x78] sm:$0xff]  ;;  %v594_v39 = vld [vmem:[%s2449_s2 + $0x80] sm:$0xff]  ;;  %v595_v40 = vld [vmem:[%s2449_s2 + $0x88] sm:$0xff] }
  0x1f   : > { %s536_s30 = scalar_lea.vmem %s2450_s29, %s1683_s19  ;;  %v1602_v38 = vpack.c.bf16 %v593_v37, %v592_v36  ;;  %v1605_v41 = vpack.c.bf16 %v595_v40, %v594_v39  ;;  %v596_v42 = vld [vmem:[%s2449_s2 + $0x90] sm:$0xff]  ;;  %v597_v43 = vld [vmem:[%s2449_s2 + $0x98] sm:$0xff]  ;;  %v598_v45 = vld [vmem:[%s2449_s2 + $0xa0] sm:$0xff]  ;;  %s2440_s29 = smov 8  }
  0x20   : > { %v1995_v10 = vld [vmem:[%s536_s30 + $0x8] sm:$0xff]  ;;  %v544_v11 = vld [vmem:[%s536_s30 + $0x10] sm:$0x3]  ;;  %v1997_v12 = vld [vmem:[%s536_s30] sm:$0xff]  ;;  %1585 = vmatpush1.bf16.msra.mxu0 %v1584_v7  ;;  %v1608_v44 = vpack.c.bf16 %v597_v43, %v596_v42  ;;  %s529_s30 = sand.u32 1, %s1811_s24   ;;  %s1472_s19 = sshll.u32 %s1982_s25, 4 }
  0x21   : > { %v550_v14 = vrot.slane %v1995_v10, 1  ;;  %v552_v15 = vrot.slane %v544_v11, 1  ;;  %v549_v16 = vrot.slane %v1997_v12, 1  ;;  %v562_v17 = vrot.slane %v1995_v10, 2  ;;  %1586 = vmatprep.subr.bf16.mxu0 %v1821_v2  ;;  %v599_v46 = vld [vmem:[%s2449_s2 + $0xa8] sm:$0xff]  ;;  %v600_v48 = vld [vmem:[%s2449_s2 + $0xb0] sm:$0xff]  ;;  %s541_s27 = scalar_lea.vmem %s2421_s1, %s1472_s19 }
  0x22   : > { %v564_v18 = vrot.slane %v544_v11, 2  ;;  %v561_v19 = vrot.slane %v1997_v12, 2  ;;  %v1611_v47 = vpack.c.bf16 %v599_v46, %v598_v45  ;;  %v601_v49 = vld [vmem:[%s2449_s2 + $0xb8] sm:$0xff]  ;;  %v602_v51 = vld [vmem:[%s2449_s2 + $0xc0] sm:$0xff]  ;;  %v603_v52 = vld [vmem:[%s2449_s2 + $0xc8] sm:$0xff]  ;;  %s1446_s20 = sshll.u32 %s529_s30, 4 }
  0x23   : > { %v553_v22 = vsel %vm548_vm0, %v550_v14, %v552_v15  ;;  %v551_v23 = vsel %vm548_vm0, %v549_v16, %v550_v14  ;;  %v1614_v50 = vpack.c.bf16 %v601_v49, %v600_v48  ;;  %v1617_v53 = vpack.c.bf16 %v603_v52, %v602_v51  ;;  %v604_v55 = vld [vmem:[%s2449_s2 + $0xd0] sm:$0xff]  ;;  %v1452_v0 = vld [vmem:[%s2451_s3] ss:$0 sm:$0xff]  ;;  %v1455_v27 = vld [vmem:[%s2425_s5 + $0x1] ss:$0 sm:$0xff]  ;;  %s1826_s2 = smov 120  }
  0x24   : > { %556 = vrot.lane.b32.xlu1 %v553_v22, %s1822_s22  ;;  %554 = vrot.lane.b32.xlu0 %v551_v23, %s1822_s22  ;;  %v565_v24 = vsel %vm560_vm1, %v562_v17, %v564_v18  ;;  %v563_v25 = vsel %vm560_vm1, %v561_v19, %v562_v17  ;;  %v719_v16 = vlaneseq  ;;  %v1459_v28 = vld [vmem:[%s2425_s5 + $0x5] ss:$0 sm:$0xff]  ;;  %v1462_v30 = vld [vmem:[%s2425_s5 + $0x8] ss:$0 sm:$0xff]  ;;  %s1473_s3 = sshll.u32 %s1940_s10, 8  ;;  %s531_s25 = scalar_lea.vmem [#allocation4], %s1446_s20 }
  0x25   : > { %1588 = vmatpush1.bf16.msra.mxu0 %v1587_v13  ;;  %v1461_v31 = vld [vmem:[%s2425_s5 + $0x7] ss:$0 sm:$0xff]  ;;  %s1368_s21 = sshll.u32 %s531_s25, 4  ;;  %s2378_s10 = scalar_lea.sflag [#allocation5], %s529_s30  ;;  %s2376_s21 = int_to_ptr.vmem [resolvable:$true] %s1368_s21 }
  0x26   : > { %1589 = vmatprep.subr.bf16.mxu0 %v1821_v2  ;;  %vm721_vm7 = vcmp.lt.s32.totalorder %v719_v16, 144  ;;  %s1757_s20 = scalar_lea.vmem %s2376_s21, 256 }
  0x27   : > { %723 = vst.msk [vmem:[#allocation2] ss:$8 sm:$0x3] %vm721_vm7, %v1824_v54  ;;  %726 = vst.msk [vmem:[#allocation2 + $0x21] ss:$8 sm:$0x3] %vm721_vm7, %v1824_v54  ;;  %p1758_p11 = scmp.ne.s32.totalorder %s2376_s21, %s1757_s20 }
  0x28   : > { %568 = vrot.lane.b32.xlu1 %v565_v24, %s1823_s28  ;;  %566 = vrot.lane.b32.xlu0 %v563_v25, %s1823_s28 }
  0x29   : > { %1591 = vmatpush1.bf16.msra.mxu0 %v1590_v26  ;;  %v1456_v26 = vld [vmem:[%s2425_s5 + $0x2] ss:$0 sm:$0xff]  ;;  %p1759_p12 = pnand %p1758_p11, %p1957_p5 }
  0x2a   : > { %1592 = vmatprep.subr.bf16.mxu0 %v1821_v2 }
  0x2b   : > { %p1760_p13 = pneg %p1759_p12 }
  0x2d   : > { %1594 = vmatpush1.bf16.msra.mxu0 %v1593_v29  ;;  %v1458_v29 = vld [vmem:[%s2425_s5 + $0x4] ss:$0 sm:$0xff] }
  0x2e   : > { %1595 = vmatprep.subr.bf16.mxu0 %v1821_v2 }
  0x31   : > { %1597 = vmatpush1.bf16.msra.mxu0 %v1596_v32 }
  0x32   : > { %1598 = vmatprep.subr.bf16.mxu0 %v1821_v2 }
  0x35   : > { %1600 = vmatpush1.bf16.msra.mxu0 %v1599_v35 }
  0x36   : > { %1601 = vmatprep.subr.bf16.mxu0 %v1821_v2 }
  0x39   : > { %1603 = vmatpush1.bf16.msra.mxu0 %v1602_v38 }
  0x3a   : > { %1604 = vmatprep.subr.bf16.mxu0 %v1821_v2 }
  0x3d   : > { %1606 = vmatpush1.bf16.msra.mxu0 %v1605_v41 }
  0x3e   : > { %1607 = vmatprep.subr.bf16.mxu0 %v1821_v2 }
  0x41   : > { %1609 = vmatpush1.bf16.msra.mxu0 %v1608_v44 }
  0x42   : > { %1610 = vmatprep.subr.bf16.mxu0 %v1821_v2 }
  0x45   : > { %1612 = vmatpush1.bf16.msra.mxu0 %v1611_v47 }
  0x46   : > { %1613 = vmatprep.subr.bf16.mxu0 %v1821_v2 }
  0x49   : > { %1615 = vmatpush1.bf16.msra.mxu0 %v1614_v50 }
  0x4a   : > { %1616 = vmatprep.subr.bf16.mxu0 %v1821_v2  ;;  %v1453_v2 = vld [vmem:[%s2424_s4] ss:$0 sm:$0xff] }
  0x4d   : > { %1618 = vmatpush1.bf16.msra.mxu0 %v1617_v53 }
  0x4e   : > { %664 = vmatprep.subr.mxu0 %v1824_v54 }
  0x51   : > { %665 = vmatpush1.msra.mxu0 %v604_v55 }
  0x96   : > { %v557_v56 = vpop.permute.xlu1 %556  ;;  %v555_v57 = vpop.permute.xlu0 %554 }
  0x97   : > { %v573_v61 = vsel %vm572_vm4, %v1997_v12, %v555_v57  ;;  %v574_v63 = vsel %vm572_vm4, %v1995_v10, %v557_v56 }
  0x9a   : > { %v569_v58 = vpop.permute.xlu1 %568  ;;  %v567_v59 = vpop.permute.xlu0 %566 }
  0x9b   : > { %v576_v60 = vsel %vm575_vm2, %v555_v57, %v567_v59  ;;  %v577_v62 = vsel %vm575_vm2, %v557_v56, %v569_v58  ;;  %vm1351_vm2 = vcmask 523264  }
  0x9c   : > { %1450 = vmatprep.mubr.msk.f32.mxu0 %vm605_vm3, %v576_v60 }
  0x9d   : > { %677 = vmatmul.mubr.f32.vlgmr.msra.gmra.mrb[0].mxu0 %v573_v61  ;;  %v1457_v61 = vld [vmem:[%s2425_s5 + $0x3] ss:$0 sm:$0xff] }
  0x9e   : > { %1451 = vmatprep.mubr.msk.f32.mxu0 %vm605_vm3, %v577_v62  ;;  %v1460_v62 = vld [vmem:[%s2425_s5 + $0x6] ss:$0 sm:$0xff] }
  0xa1   : > { %682 = vmatmul.mubr.f32.gmra.mrb[2].mxu0 %v574_v63 }
 0x170   : > { %v678_v1 = vpop.f32.mrb[0].mxu0 }
 0x171   : > { %v694_v3 = vmul.f32 %v1452_v0, %v678_v1  ;;  %v680_v4 = vpop.f32.mrb[1].mxu0 }
 0x173   : > { %v703_v5 = vadd.f32 %v1453_v2, %v694_v3 }
 0x174   : > { %v683_v6 = vpop.f32.mrb[2].mxu0 }
 0x175   : > { %v705_v7 = vsub.f32 0.0, %v703_v5  ;;  %v695_v8 = vmul.f32 %v1452_v0, %v683_v6  ;;  %v685_v9 = vpop.f32.mrb[3].mxu0 }
 0x177   : > { %v707_v10 = vmul.f32 1.442695, %v705_v7  ;;  %v704_v11 = vadd.f32 %v1453_v2, %v695_v8 }
 0x179   : > { %1733 = vpow2.f32 %v707_v10  ;;  %v706_v12 = vsub.f32 0.0, %v704_v11 }
 0x17b   : > { %v709_v13 = vmul.f32 1.442695, %v706_v12 }
 0x17d   : > { %1735 = vpow2.f32 %v709_v13 }
 0x183   : > { %v1734_v14 = vpop.eup %1733 }
 0x184   : > { %v711_v15 = vadd.f32 1.0, %v1734_v14 }
 0x186   : > { %1737 = vrcp.f32 %v711_v15 }
 0x187   : > { %v1736_v17 = vpop.eup %1735 }
 0x188   : > { %v712_v18 = vadd.f32 1.0, %v1736_v17 }
 0x18a   : > { %1739 = vrcp.f32 %v712_v18 }
 0x190   : > { %v1738_v19 = vpop.eup %1737 }
 0x191   : > { %v717_v20 = vmul.f32 %v1738_v19, %v703_v5 }
 0x193   : > { %v743_v21 = vrot.slane %v717_v20, 7 }
 0x194   : > { %v1740_v22 = vpop.eup %1739 }
 0x195   : > { %746 = vrot.lane.b32.xlu0 %v743_v21, %s2440_s29  ;;  %v718_v23 = vmul.f32 %v1740_v22, %v704_v11 }
 0x197   : > { %v744_v24 = vrot.slane %v718_v23, 7 }
 0x199   : > { %750 = vrot.lane.b32.xlu0 %v744_v24, %s2440_s29  ;;  %v745_v25 = vsel %vm742_vm12, %v743_v21, %v744_v24 }
 0x19a   : > { %748 = vrot.lane.b32.xlu1 %v745_v25, %s2440_s29 }
 0x19d   : > { %815 = vrot.lane.b32.xlu0 %v1456_v26, %s1823_s28 }
 0x19e   : > { %783 = vrot.lane.b32.xlu1 %v1455_v27, %s2440_s29 }
 0x1a1   : > { %916 = vrot.lane.b32.xlu0 %v1459_v28, %s1823_s28 }
 0x1a2   : > { %871 = vrot.lane.b32.xlu1 %v1458_v29, %s2440_s29 }
 0x1a5   : > { %1030 = vrot.lane.b32.xlu0 %v1462_v30, %s1823_s28  ;;  %s1827_s28 = smov 112  }
 0x1a6   : > { %985 = vrot.lane.b32.xlu1 %v1461_v31, %s2440_s29  ;;  %s2374_s29 = scalar_lea.hbm %s2436_s16, %s1473_s3 }
 0x207   : > { %v747_v32 = vpop.permute.xlu0 %746 }
 0x208   : > { %756 = vst.msk [vmem:[#allocation2] sm:$0xfe] %vm755_vm13, %v747_v32 }
 0x209   : > { %757 = vst.msk [vmem:[#allocation2 + $0x8] sm:$0xfe] %vm728_vm5, %v747_v32 }
 0x20b   : > { %v751_v33 = vpop.permute.xlu0 %750 }
 0x20c   : > { %762 = vst.msk [vmem:[#allocation2 + $0x20] sm:$0x1] %vm761_vm14, %v751_v33  ;;  %v749_v34 = vpop.permute.xlu1 %748 }
 0x20d   : > { %763 = vst.msk [vmem:[#allocation2 + $0x28] sm:$0x1] %vm732_vm8, %v751_v33 }
 0x20e   : > { %759 = vst.msk [vmem:[#allocation2 + $0x10] sm:$0xff] %vm758_vm15, %v749_v34 }
 0x20f   : > { %760 = vst.msk [vmem:[#allocation2 + $0x18] sm:$0xff] %vm730_vm10, %v749_v34  ;;  %v2125_v36 = vld [vmem:[#allocation2] sm:$0xff]  ;;  %v816_v40 = vpop.permute.xlu0 %815 }
 0x210   : > { %v775_v35 = vld [vmem:[#allocation2 + $0x8] sm:$0xff]  ;;  %v784_v37 = vpop.permute.xlu1 %783  ;;  %v818_v42 = vmul.f32 %v816_v40, %v2125_v36  ;;  %v841_v49 = vld [vmem:[#allocation2] sm:$0xfe] }
 0x211   : > { %v787_v38 = vmul.f32 %v784_v37, %v775_v35  ;;  %v786_v39 = vmul.f32 %v784_v37, %v2125_v36  ;;  %v819_v41 = vmul.f32 %v816_v40, %v775_v35  ;;  %v863_v48 = vld [vmem:[#allocation2 + $0x8] sm:$0xfe]  ;;  %v2151_v3 = vld [vmem:[#allocation2] sm:$0xfc]  ;;  %v848_v8 = vmul.f32 %v1457_v61, %v841_v49 }
 0x212   : > { %v962_v9 = vmul.f32 %v1460_v62, %v2151_v3 }
 0x213   : > { %796 = vrot.lane.b32.xlu0 %v787_v38, %s1826_s2  ;;  %794 = vrot.lane.b32.xlu1 %v786_v39, %s1826_s2  ;;  %v842_v55 = vld [vmem:[#allocation2 + $0x20] sm:$0x1]  ;;  %v917_v56 = vpop.permute.xlu0 %916  ;;  %v854_v24 = vrot.slane %v848_v8, 1  ;;  %v977_v38 = vld [vmem:[#allocation2 + $0x8] sm:$0xfc] }
 0x214   : > { %v872_v45 = vpop.permute.xlu1 %871  ;;  %v864_v54 = vld [vmem:[#allocation2 + $0x28] sm:$0x1]  ;;  %v920_v4 = vmul.f32 %v917_v56, %v863_v48  ;;  %v919_v6 = vmul.f32 %v917_v56, %v841_v49  ;;  %v923_v15 = vmul.f32 %v917_v56, %v842_v55  ;;  %v2162_v17 = vld [vmem:[#allocation2 + $0x20] sm:$0x3]  ;;  %v850_v22 = vmul.f32 %v1457_v61, %v842_v55 }
 0x215   : > { %v2133_v44 = vld [vmem:[#allocation2 + $0x10] sm:$0xff]  ;;  %v875_v50 = vmul.f32 %v872_v45, %v863_v48  ;;  %v874_v52 = vmul.f32 %v872_v45, %v841_v49  ;;  %v879_v59 = vmul.f32 %v872_v45, %v864_v54  ;;  %v878_v60 = vmul.f32 %v872_v45, %v842_v55 }
 0x216   : > { %v2131_v43 = vld [vmem:[#allocation2 + $0x18] sm:$0xff]  ;;  %v788_v47 = vmul.f32 %v784_v37, %v2133_v44  ;;  %v876_v53 = vmul.f32 %v872_v45, %v2133_v44  ;;  %v820_v58 = vmul.f32 %v816_v40, %v2133_v44  ;;  %v921_v13 = vmul.f32 %v917_v56, %v2133_v44 }
 0x217   : > { %828 = vrot.lane.b32.xlu0 %v819_v41, %s1827_s28  ;;  %826 = vrot.lane.b32.xlu1 %v818_v42, %s1827_s28  ;;  %v789_v46 = vmul.f32 %v784_v37, %v2131_v43  ;;  %v877_v51 = vmul.f32 %v872_v45, %v2131_v43  ;;  %v821_v57 = vmul.f32 %v816_v40, %v2131_v43  ;;  %v889_v63 = vrot.slane %v875_v50, 1 }
 0x218   : > { %v886_v1 = vrot.slane %v874_v52, 1  ;;  %v887_v2 = vrot.slane %v876_v53, 1  ;;  %v922_v5 = vmul.f32 %v917_v56, %v2131_v43  ;;  %v894_v7 = vrot.slane %v879_v59, 1  ;;  %v986_v27 = vpop.permute.xlu1 %985 }
 0x219   : > { %v890_v0 = vrot.slane %v877_v51, 1  ;;  %v892_v12 = vrot.slane %v878_v60, 1  ;;  %v924_v14 = vmul.f32 %v917_v56, %v864_v54  ;;  %v849_v18 = vmul.f32 %v1457_v61, %v2133_v44  ;;  %v978_v51 = vld [vmem:[#allocation2 + $0x28] sm:$0x3]  ;;  %v1031_v56 = vpop.permute.xlu0 %1030 }
 0x21a   : > { %v888_v11 = vsel %vm548_vm0, %v886_v1, %v887_v2  ;;  %v934_v19 = vrot.slane %v920_v4, 1  ;;  %v935_v20 = vrot.slane %v922_v5, 1  ;;  %v931_v21 = vrot.slane %v919_v6, 1 }
 0x21b   : > { %800 = vrot.lane.b32.xlu0 %v789_v46, %s1826_s2  ;;  %798 = vrot.lane.b32.xlu1 %v788_v47, %s1826_s2  ;;  %v891_v10 = vsel %vm548_vm0, %v889_v63, %v890_v0  ;;  %v895_v23 = vsel %vm548_vm0, %v890_v0, %v894_v7  ;;  %v855_v25 = vrot.slane %v849_v18, 1  ;;  %v963_v26 = vmul.f32 %v1460_v62, %v2133_v44  ;;  %v1104_v18 = vld [vmem:[%s2428_s8 + $0x18] sm:$0xff] }
 0x21c   : > { %v893_v28 = vsel %vm548_vm0, %v887_v2, %v892_v12  ;;  %v932_v29 = vrot.slane %v921_v13, 1  ;;  %v857_v30 = vrot.slane %v850_v22, 1  ;;  %v964_v31 = vmul.f32 %v1460_v62, %v2162_v17 }
 0x21d   : > { %v2172_v32 = vsel %vm548_vm0, %v854_v24, %v855_v25  ;;  %v968_v33 = vrot.slane %v962_v9, 2  ;;  %v969_v34 = vrot.slane %v963_v26, 2  ;;  %v936_v35 = vsel %vm548_vm0, %v934_v19, %v935_v20  ;;  %v1107_v26 = vld [vmem:[%s2428_s8 + $0x30] sm:$0xff] }
 0x21e   : > { %v939_v37 = vrot.slane %v924_v14, 1  ;;  %v2176_v39 = vsel %vm548_vm0, %v855_v25, %v857_v30  ;;  %v971_v40 = vrot.slane %v964_v31, 2  ;;  %v937_v41 = vrot.slane %v923_v15, 1  ;;  %v1109_v31 = vld [vmem:[%s2428_s8 + $0x40] sm:$0xff] }
 0x21f   : > { %832 = vrot.lane.b32.xlu0 %v821_v57, %s1827_s28  ;;  %830 = vrot.lane.b32.xlu1 %v820_v58, %s1827_s28  ;;  %v989_v42 = vmul.f32 %v986_v27, %v977_v38  ;;  %v991_v45 = vmul.f32 %v986_v27, %v2131_v43  ;;  %v2180_v46 = vsel %vm560_vm1, %v968_v33, %v969_v34  ;;  %v1110_v33 = vld [vmem:[%s2428_s8 + $0x48] sm:$0xff] }
 0x220   : > { %v933_v47 = vsel %vm548_vm0, %v931_v21, %v932_v29  ;;  %v988_v48 = vmul.f32 %v986_v27, %v2151_v3  ;;  %v990_v49 = vmul.f32 %v986_v27, %v2133_v44  ;;  %v2186_v50 = vsel %vm560_vm1, %v969_v34, %v971_v40  ;;  %v1106_v21 = vld [vmem:[%s2428_s8 + $0x28] sm:$0xff]  ;;  %v1113_v40 = vld [vmem:[%s2428_s8 + $0x60] sm:$0xff] }
 0x221   : > { %v993_v52 = vmul.f32 %v986_v27, %v978_v51  ;;  %v940_v53 = vsel %vm548_vm0, %v935_v20, %v939_v37  ;;  %v938_v54 = vsel %vm548_vm0, %v932_v29, %v937_v41  ;;  %v992_v55 = vmul.f32 %v986_v27, %v2162_v17  ;;  %v1105_v20 = vld [vmem:[%s2428_s8 + $0x20] sm:$0xff]  ;;  %v1108_v27 = vld [vmem:[%s2428_s8 + $0x38] sm:$0xff]  ;;  %v1114_v41 = vld [vmem:[%s2428_s8 + $0x68] sm:$0xff] }
 0x222   : > { %v1003_v57 = vrot.slane %v989_v42, 2  ;;  %v1004_v58 = vrot.slane %v991_v45, 2  ;;  %v1000_v59 = vrot.slane %v988_v48, 2  ;;  %v1001_v60 = vrot.slane %v990_v49, 2  ;;  %v1112_v37 = vld [vmem:[%s2428_s8 + $0x58] sm:$0xff]  ;;  %v1115_v45 = vld [vmem:[%s2428_s8 + $0x70] sm:$0xff] }
 0x223   : > { %898 = vrot.lane.b32.xlu0 %v891_v10, %s1826_s2  ;;  %896 = vrot.lane.b32.xlu1 %v888_v11, %s1826_s2  ;;  %v1008_v61 = vrot.slane %v993_v52, 2  ;;  %v1006_v62 = vrot.slane %v992_v55, 2  ;;  %v1034_v63 = vmul.f32 %v1031_v56, %v977_v38  ;;  %v1036_v0 = vmul.f32 %v1031_v56, %v2131_v43  ;;  %v1101_v43 = vld [vmem:[%s2428_s8] sm:$0xff]  ;;  %v1103_v11 = vld [vmem:[%s2428_s8 + $0x10] sm:$0xff] }
 0x224   : > { %v1033_v1 = vmul.f32 %v1031_v56, %v2151_v3  ;;  %v1005_v2 = vsel %vm560_vm1, %v1003_v57, %v1004_v58  ;;  %v1002_v4 = vsel %vm560_vm1, %v1000_v59, %v1001_v60  ;;  %v1035_v5 = vmul.f32 %v1031_v56, %v2133_v44  ;;  %v1102_v3 = vld [vmem:[%s2428_s8 + $0x8] sm:$0xff]  ;;  %v1454_v49 = vld [vmem:[%s2425_s5] ss:$0 sm:$0xff] }
 0x225   : > { %v1009_v6 = vsel %vm560_vm1, %v1004_v58, %v1008_v61  ;;  %v1007_v7 = vsel %vm560_vm1, %v1001_v60, %v1006_v62  ;;  %v1048_v8 = vrot.slane %v1034_v63, 2  ;;  %v1049_v9 = vrot.slane %v1036_v0, 2 }
 0x226   : > { %v1045_v10 = vrot.slane %v1033_v1, 2  ;;  %v1046_v12 = vrot.slane %v1035_v5, 2  ;;  %v1038_v13 = vmul.f32 %v1031_v56, %v978_v51  ;;  %v1037_v14 = vmul.f32 %v1031_v56, %v2162_v17 }
 0x227   : > { %902 = vrot.lane.b32.xlu0 %v895_v23, %s1826_s2  ;;  %900 = vrot.lane.b32.xlu1 %v893_v28, %s1826_s2  ;;  %v1619_v15 = vpack.c.bf16 %v1102_v3, %v1101_v43  ;;  %v1623_v19 = vpack.c.bf16 %v1104_v18, %v1103_v11  ;;  %v1050_v17 = vsel %vm560_vm1, %v1048_v8, %v1049_v9  ;;  %vm802_vm0 = vcmask 982016  }
 0x228   : > { %v1047_v22 = vsel %vm560_vm1, %v1045_v10, %v1046_v12  ;;  %v1053_v23 = vrot.slane %v1038_v13, 2  ;;  %v1051_v24 = vrot.slane %v1037_v14, 2  ;;  %v1627_v25 = vpack.c.bf16 %v1106_v21, %v1105_v20 }
 0x229   : > { %1620 = vmatprep.subr.bf16.mxu1 %v1619_v15  ;;  %v1631_v30 = vpack.c.bf16 %v1108_v27, %v1107_v26  ;;  %v1635_v34 = vpack.c.bf16 %v1110_v33, %v1109_v31  ;;  %v1643_v42 = vpack.c.bf16 %v1114_v41, %v1113_v40  ;;  %v772_v0 = vmul.f32 %v1454_v49, %v2133_v44 }
 0x22a   : > { %1622 = vmatpush3.bf16.msra.mxu1 %v1619_v15  ;;  %v1054_v28 = vsel %vm560_vm1, %v1049_v9, %v1053_v23  ;;  %v1052_v29 = vsel %vm560_vm1, %v1046_v12, %v1051_v24  ;;  %vm834_vm1 = vcmask 916480  }
 0x22b   : > { %943 = vrot.lane.b32.xlu0 %v936_v35, %s1827_s28  ;;  %941 = vrot.lane.b32.xlu1 %v933_v47, %s1827_s28  ;;  %v1111_v35 = vld [vmem:[%s2428_s8 + $0x50] sm:$0xff]  ;;  %v1116_v47 = vld [vmem:[%s2428_s8 + $0x78] sm:$0xff] }
 0x22c   : > { %1624 = vmatprep.subr.bf16.mxu1 %v1623_v19  ;;  %v1639_v38 = vpack.c.bf16 %v1112_v37, %v1111_v35  ;;  %v1647_v48 = vpack.c.bf16 %v1116_v47, %v1115_v45 }
 0x22e   : > { %1626 = vmatpush3.bf16.msra.mxu1 %v1623_v19 }
 0x22f   : > { %947 = vrot.lane.b32.xlu0 %v940_v53, %s1827_s28  ;;  %945 = vrot.lane.b32.xlu1 %v938_v54, %s1827_s28  ;;  %v771_v54 = vmul.f32 %v1454_v49, %v2125_v36 }
 0x230   : > { %1628 = vmatprep.subr.bf16.mxu1 %v1627_v25 }
 0x232   : > { %1630 = vmatpush3.bf16.msra.mxu1 %v1627_v25 }
 0x233   : > { %1012 = vrot.lane.b32.xlu0 %v1005_v2, %s1826_s2  ;;  %1010 = vrot.lane.b32.xlu1 %v1002_v4, %s1826_s2 }
 0x234   : > { %1632 = vmatprep.subr.bf16.mxu1 %v1631_v30 }
 0x236   : > { %1634 = vmatpush3.bf16.msra.mxu1 %v1631_v30 }
 0x237   : > { %1016 = vrot.lane.b32.xlu0 %v1009_v6, %s1826_s2  ;;  %1014 = vrot.lane.b32.xlu1 %v1007_v7, %s1826_s2  ;;  %s1829_s2 = smov [#allocation4]  }
 0x238   : > { %1636 = vmatprep.subr.bf16.mxu1 %v1635_v34 }
 0x23a   : > { %1638 = vmatpush3.bf16.msra.mxu1 %v1635_v34 }
 0x23b   : > { %1057 = vrot.lane.b32.xlu0 %v1050_v17, %s1827_s28  ;;  %1055 = vrot.lane.b32.xlu1 %v1047_v22, %s1827_s28 }
 0x23c   : > { %1640 = vmatprep.subr.bf16.mxu1 %v1639_v38 }
 0x23e   : > { %1642 = vmatpush3.bf16.msra.mxu1 %v1639_v38 }
 0x23f   : > { %1061 = vrot.lane.b32.xlu0 %v1054_v28, %s1827_s28  ;;  %1059 = vrot.lane.b32.xlu1 %v1052_v29, %s1827_s28 }
 0x240   : > { %1644 = vmatprep.subr.bf16.mxu1 %v1643_v42 }
 0x242   : > { %1646 = vmatpush3.bf16.msra.mxu1 %v1643_v42 }
 0x243   : > { %1648 = vmatprep.subr.bf16.mxu1 %v1647_v48 }
 0x246   : > { %1650 = vmatpush3.bf16.msra.mxu1 %v1647_v48 }
 0x285   : > { %v797_v51 = vpop.permute.xlu0 %796  ;;  %v795_v52 = vpop.permute.xlu1 %794 }
 0x286   : > { %v803_v53 = vsel %vm802_vm0, %v795_v52, %v797_v51 }
 0x287   : > { %v807_v55 = vadd.f32 %v803_v53, %v771_v54 }
 0x289   : > { %v829_v56 = vpop.permute.xlu0 %828  ;;  %v827_v57 = vpop.permute.xlu1 %826 }
 0x28a   : > { %v835_v58 = vsel %vm834_vm1, %v827_v57, %v829_v56 }
 0x28b   : > { %v839_v59 = vadd.f32 %v835_v58, %v807_v55 }
 0x28d   : > { %v801_v60 = vpop.permute.xlu0 %800  ;;  %v799_v61 = vpop.permute.xlu1 %798  ;;  %v861_v62 = vadd.f32 %v2172_v32, %v839_v59 }
 0x28e   : > { %v804_v63 = vsel %vm802_vm0, %v799_v61, %v801_v60 }
 0x28f   : > { %v808_v1 = vadd.f32 %v804_v63, %v772_v0 }
 0x291   : > { %v833_v2 = vpop.permute.xlu0 %832  ;;  %v831_v4 = vpop.permute.xlu1 %830 }
 0x292   : > { %v836_v36 = vsel %vm834_vm1, %v831_v4, %v833_v2 }
 0x293   : > { %v840_v5 = vadd.f32 %v836_v36, %v808_v1 }
 0x295   : > { %v899_v6 = vpop.permute.xlu0 %898  ;;  %v897_v7 = vpop.permute.xlu1 %896  ;;  %v862_v8 = vadd.f32 %v2176_v39, %v840_v5 }
 0x296   : > { %v904_v43 = vsel %vm802_vm0, %v897_v7, %v899_v6  ;;  %v1202_v7 = vld [vmem:[%s2429_s9] sm:$0x1] }
 0x297   : > { %v908_v3 = vadd.f32 %v904_v43, %v861_v62  ;;  %v1828_v43 = vmov 0  }
 0x298   : > { %1732 = vset.pattern.permute.xlu0 %v1828_v43 }
 0x299   : > { %v903_v9 = vpop.permute.xlu0 %902  ;;  %v901_v10 = vpop.permute.xlu1 %900 }
 0x29a   : > { %v905_v12 = vsel %vm802_vm0, %v901_v10, %v903_v9 }
 0x29b   : > { %v909_v14 = vadd.f32 %v905_v12, %v862_v8 }
 0x29d   : > { %v944_v32 = vpop.permute.xlu0 %943  ;;  %v942_v11 = vpop.permute.xlu1 %941 }
 0x29e   : > { %v949_v44 = vsel %vm834_vm1, %v942_v11, %v944_v32 }
 0x29f   : > { %v953_v13 = vadd.f32 %v949_v44, %v908_v3  ;;  %v1207_v3 = vld [vmem:[#allocation3] sm:$0x1] }
 0x2a1   : > { %v948_v15 = vpop.permute.xlu0 %947  ;;  %v946_v18 = vpop.permute.xlu1 %945  ;;  %v975_v19 = vadd.f32 %v2180_v46, %v953_v13  ;;  %v1463_v46 = vld [vmem:[%s2426_s6] ss:$0 sm:$0xff] }
 0x2a2   : > { %v950_v20 = vsel %vm834_vm1, %v946_v18, %v948_v15 }
 0x2a3   : > { %v954_v39 = vadd.f32 %v950_v20, %v909_v14  ;;  %v1239_v20 = vld [vmem:[%s2433_s13 + $0x8] sm:$0xff] }
 0x2a5   : > { %v1013_v21 = vpop.permute.xlu0 %1012  ;;  %v1011_v17 = vpop.permute.xlu1 %1010  ;;  %v976_v22 = vadd.f32 %v2186_v50, %v954_v39  ;;  %v1464_v50 = vld [vmem:[%s2427_s7] ss:$0 sm:$0xff]  ;;  %v1240_v39 = vld [vmem:[%s2433_s13 + $0x10] sm:$0xff] }
 0x2a6   : > { %v1018_v25 = vsel %vm802_vm0, %v1011_v17, %v1013_v21  ;;  %v1241_v17 = vld [vmem:[%s2433_s13 + $0x18] sm:$0xff] }
 0x2a7   : > { %v1022_v26 = vadd.f32 %v1018_v25, %v975_v19  ;;  %v1238_v19 = vld [vmem:[%s2433_s13] sm:$0xff] }
 0x2a8   : > { %v1651_v21 = vpack.c.bf16 %v1239_v20, %v1238_v19 }
 0x2a9   : > { %v1017_v23 = vpop.permute.xlu0 %1016  ;;  %v1015_v24 = vpop.permute.xlu1 %1014 }
 0x2aa   : > { %v1019_v29 = vsel %vm802_vm0, %v1015_v24, %v1017_v23  ;;  %v1242_v23 = vld [vmem:[%s2433_s13 + $0x20] sm:$0xff]  ;;  %v1243_v24 = vld [vmem:[%s2433_s13 + $0x28] sm:$0xff]  ;;  %1652 = vmatprep.subr.bf16.mxu1 %v1651_v21 }
 0x2ab   : > { %v1023_v33 = vadd.f32 %v1019_v29, %v976_v22  ;;  %v1655_v22 = vpack.c.bf16 %v1241_v17, %v1240_v39  ;;  %v1659_v25 = vpack.c.bf16 %v1243_v24, %v1242_v23  ;;  %v1246_v29 = vld [vmem:[%s2433_s13 + $0x40] sm:$0xff] }
 0x2ad   : > { %v1058_v27 = vpop.permute.xlu0 %1057  ;;  %v1056_v28 = vpop.permute.xlu1 %1055 }
 0x2ae   : > { %v1063_v30 = vsel %vm834_vm1, %v1056_v28, %v1058_v27  ;;  %v1245_v27 = vld [vmem:[%s2433_s13 + $0x38] sm:$0xff] }
 0x2af   : > { %v1067_v31 = vadd.f32 %v1063_v30, %v1022_v26  ;;  %v1244_v26 = vld [vmem:[%s2433_s13 + $0x30] sm:$0xff] }
 0x2b0   : > { %v1663_v28 = vpack.c.bf16 %v1245_v27, %v1244_v26 }
 0x2b1   : > { %v1076_v34 = vmul.f32 %v1463_v46, %v1067_v31  ;;  %v1062_v35 = vpop.permute.xlu0 %1061  ;;  %v1060_v37 = vpop.permute.xlu1 %1059  ;;  %v1248_v31 = vld [vmem:[%s2433_s13 + $0x50] sm:$0xff] }
 0x2b2   : > { %v1064_v38 = vsel %vm834_vm1, %v1060_v37, %v1062_v35  ;;  %v1251_v35 = vld [vmem:[%s2433_s13 + $0x68] sm:$0xff] }
 0x2b3   : > { %v1068_v40 = vadd.f32 %v1064_v38, %v1023_v33  ;;  %v1085_v41 = vadd.f32 %v1464_v50, %v1076_v34  ;;  %v1250_v34 = vld [vmem:[%s2433_s13 + $0x60] sm:$0xff]  ;;  %v1252_v38 = vld [vmem:[%s2433_s13 + $0x70] sm:$0xff] }
 0x2b4   : > { %v1675_v37 = vpack.c.bf16 %v1251_v35, %v1250_v34 }
 0x2b5   : > { %v1077_v42 = vmul.f32 %v1463_v46, %v1068_v40  ;;  %v1087_v45 = vsub.f32 0.0, %v1085_v41  ;;  %v1247_v46 = vld [vmem:[%s2433_s13 + $0x48] sm:$0xff]  ;;  %v1253_v40 = vld [vmem:[%s2433_s13 + $0x78] sm:$0xff] }
 0x2b6   : > { %v1667_v30 = vpack.c.bf16 %v1247_v46, %v1246_v29 }
 0x2b7   : > { %v1086_v47 = vadd.f32 %v1464_v50, %v1077_v42  ;;  %v1089_v48 = vmul.f32 1.442695, %v1087_v45  ;;  %v1249_v50 = vld [vmem:[%s2433_s13 + $0x58] sm:$0xff]  ;;  %v1216_v42 = vld [vmem:[%s2431_s11] sm:$0x1] }
 0x2b8   : > { %v1671_v33 = vpack.c.bf16 %v1249_v50, %v1248_v31  ;;  %v1224_v45 = vld [vmem:[%s2432_s12] sm:$0x1] }
 0x2b9   : > { %v1088_v49 = vsub.f32 0.0, %v1086_v47  ;;  %1741 = vpow2.f32 %v1089_v48 }
 0x2bb   : > { %v1091_v51 = vmul.f32 1.442695, %v1088_v49 }
 0x2bd   : > { %1743 = vpow2.f32 %v1091_v51 }
 0x2c3   : > { %v1742_v52 = vpop.eup %1741 }
 0x2c4   : > { %v1093_v53 = vadd.f32 1.0, %v1742_v52 }
 0x2c6   : > { %1745 = vrcp.f32 %v1093_v53 }
 0x2c7   : > { %v1744_v54 = vpop.eup %1743 }
 0x2c8   : > { %v1094_v55 = vadd.f32 1.0, %v1744_v54 }
 0x2ca   : > { %1747 = vrcp.f32 %v1094_v55  ;;  %v1233_v55 = vshrl.u32 %v719_v16, 7 }
 0x2d0   : > { %v1746_v56 = vpop.eup %1745 }
 0x2d1   : > { %v2290_v57 = vmul.f32 %v1746_v56, %v1085_v41  ;;  %v1679_v41 = vpack.c.bf16 %v1253_v40, %v1252_v38  ;;  %v1234_v56 = vsub.s32 0, %v1233_v55 }
 0x2d3   : > { %1542 = vmatprep.mubr.f32.mxu1 %v2290_v57 }
 0x2d4   : > { %v1748_v58 = vpop.eup %1747 }
 0x2d5   : > { %v2293_v59 = vmul.f32 %v1748_v58, %v1086_v47 }
 0x2d7   : > { %1543 = vmatmul.mubr.f32.vlgmr.msra.gmra.mrb[0].mxu1 %v2293_v59 }
 0x2d8   : > { %1654 = vmatpush3.bf16.msra.mxu1 %v1651_v21 }
 0x2d9   : > { %1656 = vmatprep.subr.bf16.mxu1 %v1655_v22 }
 0x2dc   : > { %1658 = vmatpush3.bf16.msra.mxu1 %v1655_v22 }
 0x2dd   : > { %1660 = vmatprep.subr.bf16.mxu1 %v1659_v25 }
 0x2e0   : > { %1662 = vmatpush3.bf16.msra.mxu1 %v1659_v25 }
 0x2e1   : > { %1664 = vmatprep.subr.bf16.mxu1 %v1663_v28 }
 0x2e4   : > { %1666 = vmatpush3.bf16.msra.mxu1 %v1663_v28 }
 0x2e5   : > { %1668 = vmatprep.subr.bf16.mxu1 %v1667_v30 }
 0x2e8   : > { %1670 = vmatpush3.bf16.msra.mxu1 %v1667_v30 }
 0x2e9   : > { %1672 = vmatprep.subr.bf16.mxu1 %v1671_v33 }
 0x2ec   : > { %1674 = vmatpush3.bf16.msra.mxu1 %v1671_v33 }
 0x2ed   : > { %1676 = vmatprep.subr.bf16.mxu1 %v1675_v37 }
 0x2f0   : > { %1678 = vmatpush3.bf16.msra.mxu1 %v1675_v37 }
 0x2f1   : > { %1680 = vmatprep.subr.bf16.mxu1 %v1679_v41 }
 0x2f4   : > { %1682 = vmatpush3.bf16.msra.mxu1 %v1679_v41 }
 0x3aa   : > { %v1544_v60 = vpop.f32.mrb[0].mxu1 }
 0x3ab   : > { %v1193_v61 = vsel %vm730_vm10, %v1544_v60, 0.0  ;;  %v1183_v62 = vpop.f32.mrb[1].mxu1 }
 0x3ac   : > { %v1192_v63 = vsel %vm730_vm10, %v1183_v62, 0.0 }
 0x3ad   : > { %v1194_v0 = vadd.f32 %v1193_v61, %v1192_v63  ;;  %v1465_v63 = vld [vmem:[%s2434_s14] ss:$0 sm:$0xff] }
 0x3af   : > { %v1195_v1 = vrot.slane %v1194_v0, 4 }
 0x3b1   : > { %v1196_v2 = vadd.f32 %v1195_v1, %v1194_v0  ;;  %v1348_v1 = vld [vmem:[%s541_s27 + $0x8] sm:$0xff] }
 0x3b3   : > { %v1197_v4 = vrot.slane %v1196_v2, 2 }
 0x3b5   : > { %v1198_v36 = vadd.f32 %v1197_v4, %v1196_v2 }
 0x3b7   : > { %v1199_v5 = vrot.slane %v1198_v36, 1 }
 0x3b9   : > { %v1200_v6 = vadd.f32 %v1199_v5, %v1198_v36  ;;  %v1347_v36 = vld [vmem:[%s541_s27] sm:$0xff]  ;;  %s1761_s27 = sshll.u32 %s1829_s2, 4  ;;  %s1762_s27 = int_to_ptr.vmem [resolvable:$false] %s1761_s27 }
 0x3ba   : > { %s1763_s3 = scalar_lea.vmem %s1762_s27, 512  ;;  %p1764_p0 = scmp.lt.s32.totalorder %s2376_s21, %s1762_s27 }
 0x3bb   : > { %v1201_v8 = vmul.f32 0.00390625, %v1200_v6  ;;  %p1765_p1 = scmp.lt.s32.totalorder %s1763_s3, %s1757_s20 }
 0x3bd   : > { %v1203_v9 = vmul.f32 %v1202_v7, %v1201_v8  ;;  %p1766_p2 = por %p1765_p1, %p1764_p0 }
 0x3bf   : > { %v1204_v10 = vsel %vm732_vm8, %v1203_v9, 0.0  ;;  %p1767_p3 = pnand %p1766_p2, %p1760_p13 }
 0x3c0   : > { %1205 = vadd.xlane.f32.xlu1 %v1204_v10 }
 0x44d   : > { %v1206_v32 = vpop.xlane.xlu1 %1205 }
 0x44e   : > { %v1208_v11 = vadd.f32 %v1207_v3, %v1206_v32 }
 0x450   : > { %v1209_v12 = vsub.f32 0.0, %v1208_v11 }
 0x452   : > { %v1210_v44 = vmul.f32 1.442695, %v1209_v12 }
 0x454   : > { %1749 = vpow2.f32 %v1210_v44 }
 0x45e   : > { %v1750_v13 = vpop.eup %1749 }
 0x45f   : > { %v1212_v14 = vadd.f32 1.0, %v1750_v13 }
 0x461   : > { %1751 = vrcp.f32 %v1212_v14 }
 0x46b   : > { %v1752_v15 = vpop.eup %1751 }
 0x46c   : > { %v1215_v18 = vmul.f32 %v1752_v15, %v1208_v11 }
 0x46e   : > { %1219 = vperm.xlu0 %1732, %v1215_v18  }
 0x4ed   : > { %v1220_v47 = vpop.permute.xlu0 %1219 }
 0x4ee   : > { %v1222_v48 = vmul.f32 %v1220_v47, %v1216_v42 }
 0x4f0   : > { %v1225_v49 = vadd.f32 %v1224_v45, %v1222_v48 }
 0x4f2   : > { %v1226_v51 = vsub.f32 0.0, %v1225_v49 }
 0x4f4   : > { %v1227_v52 = vmul.f32 1.442695, %v1226_v51 }
 0x4f6   : > { %1753 = vpow2.f32 %v1227_v52 }
 0x500   : > { %v1754_v53 = vpop.eup %1753 }
 0x501   : > { %v1229_v54 = vadd.f32 1.0, %v1754_v53 }
 0x503   : > { %1755 = vrcp.f32 %v1229_v54 }
 0x50d   : > { %v1756_v58 = vpop.eup %1755 }
 0x50e   : > { %v1235_v60 = vrot.slane %v1756_v58, %v1234_v56 }
 0x510   : > { %v1236_v61 = vmul.f32 %v1235_v60, %v2290_v57  ;;  %v1237_v62 = vmul.f32 %v1235_v60, %v2293_v59  ;;  %v1466_v57 = vld [vmem:[%s2435_s15] ss:$0 sm:$0xff] }
 0x512   : > { %1577 = vmatprep.mubr.f32.mxu1 %v1236_v61 }
 0x513   : > { %1578 = vmatmul.mubr.f32.vlgmr.msra.gmra.mrb[2].mxu1 %v1237_v62 }
 0x5e6   : > { %v1579_v16 = vpop.f32.mrb[2].mxu1 }
 0x5e7   : > { %v1337_v0 = vmul.f32 %v1579_v16, %v1465_v63  ;;  %v1320_v59 = vpop.f32.mrb[3].mxu1 }
 0x5e8   : > { %v1336_v2 = vmul.f32 %v1465_v63, %v1320_v59 }
 0x5e9   : > { %v1346_v4 = vadd.f32 %v1466_v57, %v1337_v0 }
 0x5ea   : > { %v1345_v5 = vadd.f32 %v1466_v57, %v1336_v2 }
 0x5eb   : > { %v1350_v6 = vadd.f32 %v1348_v1, %v1346_v4 }
 0x5ec   : > { %v1349_v7 = vadd.f32 %v1347_v36, %v1345_v5 }
 0x5ed   : > { %1353 = vst.msk [vmem:[%s531_s25 + $0x8] sm:$0xff] %vm1351_vm2, %v1350_v6 }
 0x5ee   : > { %1352 = vst.msk [vmem:[%s531_s25] sm:$0xff] %vm1351_vm2, %v1349_v7 }
 0x5ef   : > { %1770 = shalt.err (!%p1767_p3)
}
 0x5f0   : > { %s1771_s30 = scalar_lea.hbm %s2374_s29, 256  ;;  %s1775_s25 = scalar_lea.hbm %s2436_s16, 512 }
 0x5f1   : > { %p1772_p4 = scmp.ne.s32.totalorder %s2374_s29, %s1771_s30  ;;  %p1776_p9 = scmp.lt.u32.totalorder %s2374_s29, %s2436_s16 }
 0x5f2   : > { %p1777_p10 = scmp.lt.u32.totalorder %s1775_s25, %s1771_s30  ;;  %p1779_p12 = scmp.lt.u32.totalorder %s1771_s30, %s2374_s29 }
 0x5f3   : > { %p1773_p7 = pnand %p1772_p4, %p1957_p5 }
 0x5f4   : > { %p1778_p11 = por %p1777_p10, %p1776_p9 }
 0x5f5   : > { %p1774_p8 = pneg %p1773_p7 }
 0x5f6   : > { %p1780_p13 = por %p1779_p12, %p1778_p11 }
 0x5f8   : > { %p1781_p0 = pnand %p1780_p13, %p1774_p8 }
 0x5fa   : > { %1784 = shalt.err (!%p1781_p0)
}
 0x5fb   : > { %s1830_s20 = smov 128   ;;  %s2452_s2 = smov 8  }
 0x5fc   : > { %1684 = dma.vmem_to_hbm [thread:$0]  (%p1957_p5), %s2376_s21, 256, %s2374_s29, %s2378_s10, %s1830_s20, %s1830_s20, %s2452_s2  }
 0x5fd PF: > { %p1690_p1 = scmp.ge.s32.totalorder %s1819_s26, 2  ;;  %s1383_s27 = sand.u32 1, %s1807_s23  }
 0x5fe   : > { %s1384_s3 = scalar_lea.sflag [#allocation5], %s1383_s27 }
 0x5ff   : > { %p1687_p2 = pnand %p1690_p1, %p1961_p6 }
 0x601   : > { %1802 = dma.done.wait (!%p1687_p2), %s1384_s3, 256  }
 0x602   : > { %1804 = vsyncadd (!%p1687_p2), %s1384_s3, 4294967040  ;;  %s2453_s26 = sld [smem:[#allocation8_spill]]  ;;  %s2454_s30 = sld [smem:[#allocation7_spill]] }
 0x603   : > { %s2455_s25 = sld [smem:[#allocation9_spill]]  ;;  %s2456_s23 = smov %s1811_s24 }
 0x608   : > { %p28_p3 = scmp.ge.s32.totalorder %s2453_s26, 4   ;;  %s2457_s24 = smov %s2454_s30 }
 0x60a   :  { %30 = sbr.rel (!%p28_p3) target bundleno = 7 (0x7), region = 123 }
 0x611   :  { %1389 = vsyncpa [#allocation5], 1 }
 0x612   :  { %1391 = vsyncpa [#allocation5 + $0x1], 1 }

</bundles_post_ra>
